<compile_context>
chip_gen: v6e
topology: v6e:2x2x1
jax: 0.10.0
libtpu: 0.0.40
codegen_flags: <defaults>
</compile_context>

<pallas_src>
import jax
import jax.numpy as jnp
from jax.experimental import pallas as pl
from jax.experimental.pallas import tpu as pltpu

EPS = 1e-5  # PyTorch BatchNorm1d default
MB = 1024 * 1024


def _round_up(x, m):
    return ((x + m - 1) // m) * m


def _vmem_capacity_bytes():
    """Per-core VMEM capacity; conservative fallback if the query is unavailable."""
    try:
        return int(pltpu.get_tpu_info().vmem_capacity_bytes)
    except Exception:
        return 64 * MB  # v7x per-TensorCore budget (smallest of v5e/v6e/v7x)


def _lma_kernel(
    pool_ref,                                      # (N_sp, TILE)  bf16  0/1 assignment
    skips_ref,                                     # (TILE, 256)   bf16  autoenc features
    coords_ref,                                    # (TILE, 4)     f32   (xx, yy, fx, fy)
    counts_ref,                                    # (N_sp, 1)     f32   pixels per superpixel
    gc_ref, bc_ref,                                # bn_coords gamma/beta        (1, 4)
    w1_ref, b1_ref,                                # coords1 conv 4->32          (4, 32), (1, 32)
    w2_ref, b2_ref,                                # coords1 conv 32->64         (32, 64), (1, 64)
    gr_ref, br_ref,                                # bn_reduc gamma/beta         (1, 256)
    ws_ref,                                        # skip_reduc1 conv 256->512   (256, 512)
    g5_ref, b5_ref,                                # skip_reduc1 BN(512)         (1, 512)
    wmc_ref, wms_ref, bm_ref,                      # merger2 split weights/bias  (64,256),(512,256),(1,256)
    siam_ref, pos_ref,                             # outputs (N_sp, 256), (N_sp, 2)
    acc_sk, acc_co,                                # VMEM scratch (N_sp, 256), (N_sp, 4)  f32
):
    f32 = jnp.float32
    t = pl.program_id(0)

    @pl.when(t == 0)
    def _():
        acc_sk[...] = jnp.zeros_like(acc_sk)
        acc_co[...] = jnp.zeros_like(acc_co)

    # Fused superpixel sum pooling over this pixel tile.
    #  - autoenc path: bf16 x bf16 MXU matmul, exact f32 accumulation (pool entries are 0/1).
    #  - coord/flow path: kept in f32 so the pos output stays at 1e-5 fidelity.
    pool_bf = pool_ref[...]
    acc_sk[...] += jnp.dot(pool_bf, skips_ref[...], preferred_element_type=f32)
    acc_co[...] += jnp.dot(pool_bf.astype(f32), coords_ref[...], preferred_element_type=f32)

    @pl.when(t == pl.num_programs(0) - 1)
    def _():
        # Normalize the accumulated sums -> means (sp_pool), in f32.
        inv_cnt = 1.0 / counts_ref[...]                # (N_sp, 1)
        pooled_co = acc_co[...] * inv_cnt              # (N_sp, 4)
        pooled_sk = acc_sk[...] * inv_cnt              # (N_sp, 256)
        pos_ref[...] = pooled_co[:, :2]                # pooled (xx, yy)

        def bn(h, gamma, beta):
            # Training-mode batch statistics (biased variance); gamma folded into the rsqrt.
            mean = jnp.mean(h, axis=0, keepdims=True)
            var = jnp.mean((h - mean) ** 2, axis=0, keepdims=True)
            scale = gamma * jax.lax.rsqrt(var + EPS)
            return (h - mean) * scale + beta

        # Coords branch: BN(4) -> Conv1d(4,32,k=1) -> [Dropout=id] -> Conv1d(32,64,k=1) -> ReLU
        c = bn(pooled_co, gc_ref[...], bc_ref[...])
        c = jnp.dot(c, w1_ref[...], preferred_element_type=f32) + b1_ref[...]
        c = jnp.dot(c, w2_ref[...], preferred_element_type=f32) + b2_ref[...]
        c = jnp.maximum(c, 0.0)                        # (N_sp, 64)

        # Skip branch: BN(256) -> Conv1d(256,512,k=1) -> [Dropout=id] -> BN(512) -> ReLU
        # Conv bias omitted: a per-channel constant is exactly cancelled by training-mode BN.
        s = bn(pooled_sk, gr_ref[...], br_ref[...])
        s = jnp.dot(s, ws_ref[...], preferred_element_type=f32)
        s = bn(s, g5_ref[...], b5_ref[...])
        s = jnp.maximum(s, 0.0)                        # (N_sp, 512)

        # merger2: [Dropout=id] -> Linear(576, 256), fused over the virtual concat [c | s].
        siam_ref[...] = (jnp.dot(c, wmc_ref[...], preferred_element_type=f32)
                         + jnp.dot(s, wms_ref[...], preferred_element_type=f32)
                         + bm_ref[...])


def _coord_maps(B, H, W, n_pix):
    """make_coord_map equivalent: normalized row/col index maps, flattened to (n_pix,).
    Note: divides by (H-1)/(W-1) like the PyTorch code -> degenerate for H==1 or W==1."""
    xx = jnp.broadcast_to((jnp.arange(H, dtype=jnp.float32) / (H - 1))[:, None], (H, W))
    yy = jnp.broadcast_to((jnp.arange(W, dtype=jnp.float32) / (W - 1))[None, :], (H, W))
    xx = jnp.broadcast_to(xx[None], (B, H, W)).reshape(n_pix)
    yy = jnp.broadcast_to(yy[None], (B, H, W)).reshape(n_pix)
    return xx, yy


def _linearize_labels(labels, B, n_pix, n_sp_per_img):
    """linearize_labels: per-image superpixel ids -> batch-global ids, flattened to (n_pix,)."""
    return (labels + jnp.arange(B, dtype=labels.dtype)[:, None, None] * n_sp_per_img
            ).reshape(n_pix)


def loc_motion_appearance(image, labels, fx, fy, autoenc_feats, params, n_sp_per_img):
    B, _, H, W = image.shape
    skip_dims = autoenc_feats.shape[1]
    n_pix = B * H * W
    n_sp = B * n_sp_per_img
    d_coords = params["w_coords2"].shape[0]         # 64
    d_merge = params["w_merge"].shape[0]            # 256

    # ---- pooling operands (built directly in kernel layouts; no one_hot + transpose of P) ----
    labels_lin = _linearize_labels(labels, B, n_pix, n_sp_per_img)
    sp_ids = jnp.arange(n_sp, dtype=labels_lin.dtype)
    pool01 = (labels_lin[None, :] == sp_ids[:, None]).astype(jnp.bfloat16)   # (n_sp, n_pix) 0/1
    counts = jax.ops.segment_sum(jnp.ones((n_pix,), jnp.float32), labels_lin,
                                 num_segments=n_sp)
    counts = jnp.maximum(counts, 1.0).reshape(n_sp, 1)                       # f32, guard empties

    xx, yy = _coord_maps(B, H, W, n_pix)
    coords_pix = jnp.concatenate(
        [xx[:, None], yy[:, None], fx.reshape(n_pix, 1), fy.reshape(n_pix, 1)],
        axis=1).astype(jnp.float32)                                          # (n_pix, 4) f32

    # bf16 cast fused into the single NHWC transpose (no extra concat pass over the big slab).
    skips_pix = jnp.transpose(autoenc_feats, (0, 2, 3, 1)).reshape(
        n_pix, skip_dims).astype(jnp.bfloat16)                               # (n_pix, 256) bf16

    # ---- tile the pixel (reduction) axis from a per-generation VMEM budget ----
    vmem_cap = _vmem_capacity_bytes()
    # bytes streamed per pixel row: double-buffered bf16 pool row + bf16 skips row + f32 coords
    # row, plus the in-kernel f32 cast of the pool tile used by the coords matmul.
    row_bytes = 2 * (n_sp * 2 + skip_dims * 2 + 4 * 4) + n_sp * 4
    stream_budget = min(max(vmem_cap - 24 * MB, 16 * MB), 96 * MB)
    tile = stream_budget // row_bytes
    tile = int(max(1024, min(tile, 8192)))          # >=1024 px/step (amortize grid overhead)
    tile = min(tile, _round_up(n_pix, 128))
    tile = _round_up(tile, 128)
    n_pix_p = _round_up(n_pix, tile)
    if n_pix_p != n_pix:                            # zero rows/cols contribute nothing
        pad = n_pix_p - n_pix
        pool01 = jnp.pad(pool01, ((0, 0), (0, pad)))
        skips_pix = jnp.pad(skips_pix, ((0, pad), (0, 0)))
        coords_pix = jnp.pad(coords_pix, ((0, pad), (0, 0)))
    n_tiles = n_pix_p // tile

    # ---- weight prep (PyTorch (out, in) -> (in, out)); biases as (1, C) rows ----
    gc = params["bn_coords_gamma"].reshape(1, -1)
    bc = params["bn_coords_beta"].reshape(1, -1)
    w1 = params["w_coords1"].T
    b1 = params["b_coords1"].reshape(1, -1)
    w2 = params["w_coords2"].T
    b2 = params["b_coords2"].reshape(1, -1)
    gr = params["bn_reduc_gamma"].reshape(1, -1)
    br = params["bn_reduc_beta"].reshape(1, -1)
    ws = params["w_skip"].T                          # bias dropped (cancelled by BN512)
    g5 = params["bn_512_gamma"].reshape(1, -1)
    b5 = params["bn_512_beta"].reshape(1, -1)
    wm_t = params["w_merge"].T                       # (576, 256)
    wmc, wms = wm_t[:d_coords], wm_t[d_coords:]
    bm = params["b_merge"].reshape(1, -1)
    weights = (gc, bc, w1, b1, w2, b2, gr, br, ws, g5, b5, wmc, wms, bm)

    # ---- explicit VMEM budget from actual usage (items 6/7) ----
    streamed_bytes = tile * 2 * (n_sp * 2 + skip_dims * 2 + 4 * 4)
    cast_tmp_bytes = tile * n_sp * 4
    weight_bytes = 2 * sum(int(w.size) * w.dtype.itemsize for w in weights)
    misc_bytes = (2 * n_sp * 128 * 4                 # counts (lane-padded, double-buffered)
                  + n_sp * (skip_dims + 128) * 4     # accumulators
                  + 2 * n_sp * (d_merge + 128) * 4)  # outputs (double-buffered)
    vmem_limit = streamed_bytes + cast_tmp_bytes + weight_bytes + misc_bytes + 8 * MB
    vmem_limit = int(min(max(vmem_limit, 32 * MB), max(vmem_cap - 2 * MB, 32 * MB)))

    def _full_spec(arr):
        return pl.BlockSpec(arr.shape, lambda t: (0,) * arr.ndim)

    grid_spec = pltpu.PrefetchScalarGridSpec(
        num_scalar_prefetch=0,
        grid=(n_tiles,),
        in_specs=[pl.BlockSpec((n_sp, tile), lambda t: (0, t)),        # pool (contiguous rows)
                  pl.BlockSpec((tile, skip_dims), lambda t: (t, 0)),   # bf16 autoenc features
                  pl.BlockSpec((tile, 4), lambda t: (t, 0)),           # f32 coord/flow columns
                  pl.BlockSpec((n_sp, 1), lambda t: (0, 0))]           # f32 counts
                 + [_full_spec(w) for w in weights],
        out_specs=(pl.BlockSpec((n_sp, d_merge), lambda t: (0, 0)),
                   pl.BlockSpec((n_sp, 2), lambda t: (0, 0))),
        scratch_shapes=[pltpu.VMEM((n_sp, skip_dims), jnp.float32),
                        pltpu.VMEM((n_sp, 4), jnp.float32)],
    )

    siam, pos = pl.pallas_call(
        _lma_kernel,
        out_shape=(jax.ShapeDtypeStruct((n_sp, d_merge), jnp.float32),
                   jax.ShapeDtypeStruct((n_sp, 2), jnp.float32)),
        grid_spec=grid_spec,
        compiler_params=pltpu.CompilerParams(
            dimension_semantics=("arbitrary",),      # pixel axis is a reduction
            vmem_limit_bytes=vmem_limit),
    )(pool01, skips_pix, coords_pix, counts, *weights)

    return {"siam_feats": siam, "pos": pos}


def loc_motion_appearance_ref(image, labels, fx, fy, autoenc_feats, params, n_sp_per_img):
    """Pure-JAX faithful reference of the PyTorch forward (dropout = identity, f32)."""
    B, _, H, W = image.shape
    skip_dims = autoenc_feats.shape[1]
    n_pix = B * H * W
    n_sp = B * n_sp_per_img
    xx, yy = _coord_maps(B, H, W, n_pix)
    labels_lin = _linearize_labels(labels, B, n_pix, n_sp_per_img)
    onehot = jax.nn.one_hot(labels_lin, n_sp, dtype=jnp.float32)     # (n_pix, n_sp)
    counts = jnp.maximum(onehot.sum(axis=0), 1.0)
    pool = onehot.T / counts[:, None]                                # (n_sp, n_pix)

    def sp_pool(m):
        return pool @ m

    xx_p, yy_p = sp_pool(xx), sp_pool(yy)
    fx_p, fy_p = sp_pool(fx.reshape(n_pix)), sp_pool(fy.reshape(n_pix))
    coords = jnp.stack([xx_p, yy_p, fx_p, fy_p], axis=1)

    def bn(h, g, b):
        mean = h.mean(axis=0, keepdims=True)
        var = ((h - mean) ** 2).mean(axis=0, keepdims=True)
        return (h - mean) / jnp.sqrt(var + EPS) * g[None, :] + b[None, :]

    c = bn(coords, params["bn_coords_gamma"], params["bn_coords_beta"])
    c = c @ params["w_coords1"].T + params["b_coords1"]
    c = c @ params["w_coords2"].T + params["b_coords2"]
    c = jnp.maximum(c, 0.0)

    skips_p = sp_pool(jnp.transpose(autoenc_feats, (0, 2, 3, 1)).reshape(n_pix, skip_dims))
    s = bn(skips_p, params["bn_reduc_gamma"], params["bn_reduc_beta"])
    s = s @ params["w_skip"].T + params["b_skip"]
    s = bn(s, params["bn_512_gamma"], params["bn_512_beta"])
    s = jnp.maximum(s, 0.0)

    feats = jnp.concatenate([c, s], axis=1)
    siam = feats @ params["w_merge"].T + params["b_merge"]
    pos = jnp.stack([xx_p, yy_p], axis=1)
    return {"siam_feats": siam, "pos": pos}


def init_params(key, pos_components=4, skip_dims=256, hidden1=32, hidden2=64,
                skip_hidden=512, merge_out=256):
    ks = jax.random.split(key, 14)
    s = 0.05
    nrm = jax.random.normal
    return {
        "bn_coords_gamma": 1.0 + 0.1 * nrm(ks[0], (pos_components,), jnp.float32),
        "bn_coords_beta": 0.1 * nrm(ks[1], (pos_components,), jnp.float32),
        "w_coords1": s * nrm(ks[2], (hidden1, pos_components), jnp.float32),
        "b_coords1": s * nrm(ks[3], (hidden1,), jnp.float32),
        "w_coords2": s * nrm(ks[4], (hidden2, hidden1), jnp.float32),
        "b_coords2": s * nrm(ks[5], (hidden2,), jnp.float32),
        "bn_reduc_gamma": 1.0 + 0.1 * nrm(ks[6], (skip_dims,), jnp.float32),
        "bn_reduc_beta": 0.1 * nrm(ks[7], (skip_dims,), jnp.float32),
        "w_skip": s * nrm(ks[8], (skip_hidden, skip_dims), jnp.float32),
        "b_skip": s * nrm(ks[9], (skip_hidden,), jnp.float32),
        "bn_512_gamma": 1.0 + 0.1 * nrm(ks[10], (skip_hidden,), jnp.float32),
        "bn_512_beta": 0.1 * nrm(ks[11], (skip_hidden,), jnp.float32),
        "w_merge": s * nrm(ks[12], (merge_out, hidden2 + skip_hidden), jnp.float32),
        "b_merge": s * nrm(ks[13], (merge_out,), jnp.float32),
    }


if __name__ == "__main__":
    key = jax.random.PRNGKey(0)
    B, H, W = 2, 16, 16
    skip_dims = 256
    sp_grid = 4                                   # 4x4 block "superpixels" -> 16 per image
    n_sp_per_img = sp_grid * sp_grid
    n_sp = B * n_sp_per_img

    k_img, k_fx, k_fy, k_feat, k_p = jax.random.split(key, 5)
    image = jax.random.normal(k_img, (B, 3, H, W), jnp.float32)
    fx = jax.random.normal(k_fx, (B, 1, H, W), jnp.float32)
    fy = jax.random.normal(k_fy, (B, 1, H, W), jnp.float32)
    autoenc_feats = jax.random.normal(k_feat, (B, skip_dims, H, W), jnp.float32)

    # Deterministic SLIC-like superpixel labels: 4x4 pixel blocks, ids in [0, 16) per image.
    ii = jnp.arange(H) // (H // sp_grid)
    jj = jnp.arange(W) // (W // sp_grid)
    labels = (ii[:, None] * sp_grid + jj[None, :]).astype(jnp.int32)
    labels = jnp.broadcast_to(labels[None], (B, H, W))

    params = init_params(k_p, pos_components=4, skip_dims=skip_dims)

    out = loc_motion_appearance(image, labels, fx, fy, autoenc_feats, params, n_sp_per_img)
    out = jax.block_until_ready(out)
    assert out["siam_feats"].shape == (n_sp, 256)
    assert out["pos"].shape == (n_sp, 2)

    # Tight check against a reference fed the same bf16-quantized autoenc features
    # (isolates kernel correctness from the intentional bf16 streaming of the skip slab).
    autoenc_q = autoenc_feats.astype(jnp.bfloat16).astype(jnp.float32)
    ref_q = loc_motion_appearance_ref(image, labels, fx, fy, autoenc_q, params, n_sp_per_img)
    assert jnp.allclose(out["pos"], ref_q["pos"], atol=1e-5, rtol=1e-5)
    assert jnp.allclose(out["siam_feats"], ref_q["siam_feats"], atol=2e-3, rtol=2e-3)

    # Loose check against the full-f32 reference (documents the bf16 feature-quantization impact).
    ref = loc_motion_appearance_ref(image, labels, fx, fy, autoenc_feats, params, n_sp_per_img)
    assert jnp.allclose(out["pos"], ref["pos"], atol=1e-5, rtol=1e-5)
    assert jnp.allclose(out["siam_feats"], ref["siam_feats"], atol=5e-2, rtol=5e-2)

    print("KERNEL_OK")
</pallas_src>

<mosaic_0001>
module attributes {stable_mosaic.version = 11 : i64} {
  func.func @_lma_kernel(%arg0: i32, %arg1: memref<32x512xbf16, #tpu.memory_space<vmem>>, %arg2: memref<512x256xbf16, #tpu.memory_space<vmem>>, %arg3: memref<512x4xf32, #tpu.memory_space<vmem>>, %arg4: memref<32x1xf32, #tpu.memory_space<vmem>>, %arg5: memref<1x4xf32, #tpu.memory_space<vmem>>, %arg6: memref<1x4xf32, #tpu.memory_space<vmem>>, %arg7: memref<4x32xf32, #tpu.memory_space<vmem>>, %arg8: memref<1x32xf32, #tpu.memory_space<vmem>>, %arg9: memref<32x64xf32, #tpu.memory_space<vmem>>, %arg10: memref<1x64xf32, #tpu.memory_space<vmem>>, %arg11: memref<1x256xf32, #tpu.memory_space<vmem>>, %arg12: memref<1x256xf32, #tpu.memory_space<vmem>>, %arg13: memref<256x512xf32, #tpu.memory_space<vmem>>, %arg14: memref<1x512xf32, #tpu.memory_space<vmem>>, %arg15: memref<1x512xf32, #tpu.memory_space<vmem>>, %arg16: memref<64x256xf32, #tpu.memory_space<vmem>>, %arg17: memref<512x256xf32, #tpu.memory_space<vmem>>, %arg18: memref<1x256xf32, #tpu.memory_space<vmem>>, %arg19: memref<32x256xf32, #tpu.memory_space<vmem>>, %arg20: memref<32x2xf32, #tpu.memory_space<vmem>>, %arg21: memref<32x256xf32, #tpu.memory_space<vmem>>, %arg22: memref<32x4xf32, #tpu.memory_space<vmem>>) attributes {dimension_semantics = [#tpu.dimension_semantics<arbitrary>], iteration_bounds = array<i64: 1>, scalar_prefetch = 0 : i64, scratch_operands = 2 : i64, tpu.core_type = #tpu.core_type<tc>, window_params = [{transform_indices = @transform_0, window_bounds = array<i64: 32, 512>}, {transform_indices = @transform_1, window_bounds = array<i64: 512, 256>}, {transform_indices = @transform_2, window_bounds = array<i64: 512, 4>}, {pipeline_mode = #tpu.pipeline_mode<synchronous>, transform_indices = @transform_3, window_bounds = array<i64: 32, 1>}, {pipeline_mode = #tpu.pipeline_mode<synchronous>, transform_indices = @transform_4, window_bounds = array<i64: 1, 4>}, {pipeline_mode = #tpu.pipeline_mode<synchronous>, transform_indices = @transform_5, window_bounds = array<i64: 1, 4>}, {pipeline_mode = #tpu.pipeline_mode<synchronous>, transform_indices = @transform_6, window_bounds = array<i64: 4, 32>}, {pipeline_mode = #tpu.pipeline_mode<synchronous>, transform_indices = @transform_7, window_bounds = array<i64: 1, 32>}, {pipeline_mode = #tpu.pipeline_mode<synchronous>, transform_indices = @transform_8, window_bounds = array<i64: 32, 64>}, {pipeline_mode = #tpu.pipeline_mode<synchronous>, transform_indices = @transform_9, window_bounds = array<i64: 1, 64>}, {pipeline_mode = #tpu.pipeline_mode<synchronous>, transform_indices = @transform_10, window_bounds = array<i64: 1, 256>}, {pipeline_mode = #tpu.pipeline_mode<synchronous>, transform_indices = @transform_11, window_bounds = array<i64: 1, 256>}, {pipeline_mode = #tpu.pipeline_mode<synchronous>, transform_indices = @transform_12, window_bounds = array<i64: 256, 512>}, {pipeline_mode = #tpu.pipeline_mode<synchronous>, transform_indices = @transform_13, window_bounds = array<i64: 1, 512>}, {pipeline_mode = #tpu.pipeline_mode<synchronous>, transform_indices = @transform_14, window_bounds = array<i64: 1, 512>}, {pipeline_mode = #tpu.pipeline_mode<synchronous>, transform_indices = @transform_15, window_bounds = array<i64: 64, 256>}, {pipeline_mode = #tpu.pipeline_mode<synchronous>, transform_indices = @transform_16, window_bounds = array<i64: 512, 256>}, {pipeline_mode = #tpu.pipeline_mode<synchronous>, transform_indices = @transform_17, window_bounds = array<i64: 1, 256>}, {pipeline_mode = #tpu.pipeline_mode<synchronous>, transform_indices = @transform_18, window_bounds = array<i64: 32, 256>}, {pipeline_mode = #tpu.pipeline_mode<synchronous>, transform_indices = @transform_19, window_bounds = array<i64: 32, 2>}]} {
    %c0_i32 = arith.constant 0 : i32
    %0 = arith.cmpi eq, %arg0, %c0_i32 : i32
    %1 = arith.extui %0 : i1 to i32
    %c0_i32_0 = arith.constant 0 : i32
    %2 = arith.cmpi ne, %1, %c0_i32_0 : i32
    scf.if %2 {
      %cst_17 = arith.constant 0.000000e+00 : f32
      %18 = vector.broadcast %cst_17 : f32 to vector<32x256xf32>
      %c0_18 = arith.constant 0 : index
      %c0_19 = arith.constant 0 : index
      %19 = vector.load %arg21[%c0_18, %c0_19] : memref<32x256xf32, #tpu.memory_space<vmem>>, vector<32x256xf32>
      tpu.vector_store %arg21[%c0_18, %c0_19], %18 {strides = array<i32>} : memref<32x256xf32, #tpu.memory_space<vmem>>, vector<32x256xf32>,
      %cst_20 = arith.constant 0.000000e+00 : f32
      %20 = vector.broadcast %cst_20 : f32 to vector<32x4xf32>
      %c0_21 = arith.constant 0 : index
      %c0_22 = arith.constant 0 : index
      %21 = vector.load %arg22[%c0_21, %c0_22] : memref<32x4xf32, #tpu.memory_space<vmem>>, vector<32x4xf32>
      tpu.vector_store %arg22[%c0_21, %c0_22], %20 {strides = array<i32>} : memref<32x4xf32, #tpu.memory_space<vmem>>, vector<32x4xf32>,
    } else {
    }
    %c0 = arith.constant 0 : index
    %c0_1 = arith.constant 0 : index
    %3 = vector.load %arg1[%c0, %c0_1] : memref<32x512xbf16, #tpu.memory_space<vmem>>, vector<32x512xbf16>
    %c0_2 = arith.constant 0 : index
    %c0_3 = arith.constant 0 : index
    %4 = vector.load %arg21[%c0_2, %c0_3] : memref<32x256xf32, #tpu.memory_space<vmem>>, vector<32x256xf32>
    %c0_4 = arith.constant 0 : index
    %c0_5 = arith.constant 0 : index
    %5 = vector.load %arg2[%c0_4, %c0_5] : memref<512x256xbf16, #tpu.memory_space<vmem>>, vector<512x256xbf16>
    %cst = arith.constant dense<0.000000e+00> : vector<32x256xf32>
    %6 = tpu.matmul %3, %5, %cst {dimension_numbers = #tpu.dot_dimension_numbers<[1], [0], [0], [1], [0, 0, 1, 1], [], []>} : vector<32x512xbf16>, vector<512x256xbf16>, vector<32x256xf32> -> vector<32x256xf32>
    %7 = arith.addf %4, %6 : vector<32x256xf32>
    %c0_6 = arith.constant 0 : index
    %c0_7 = arith.constant 0 : index
    %8 = vector.load %arg21[%c0_6, %c0_7] : memref<32x256xf32, #tpu.memory_space<vmem>>, vector<32x256xf32>
    tpu.vector_store %arg21[%c0_6, %c0_7], %7 {strides = array<i32>} : memref<32x256xf32, #tpu.memory_space<vmem>>, vector<32x256xf32>,
    %c0_8 = arith.constant 0 : index
    %c0_9 = arith.constant 0 : index
    %9 = vector.load %arg22[%c0_8, %c0_9] : memref<32x4xf32, #tpu.memory_space<vmem>>, vector<32x4xf32>
    %10 = arith.extf %3 : vector<32x512xbf16> to vector<32x512xf32>
    %c0_10 = arith.constant 0 : index
    %c0_11 = arith.constant 0 : index
    %11 = vector.load %arg3[%c0_10, %c0_11] : memref<512x4xf32, #tpu.memory_space<vmem>>, vector<512x4xf32>
    %cst_12 = arith.constant dense<0.000000e+00> : vector<32x4xf32>
    %12 = tpu.matmul %10, %11, %cst_12 {dimension_numbers = #tpu.dot_dimension_numbers<[1], [0], [0], [1], [0, 0, 1, 1], [], []>} : vector<32x512xf32>, vector<512x4xf32>, vector<32x4xf32> -> vector<32x4xf32>
    %13 = arith.addf %9, %12 : vector<32x4xf32>
    %c0_13 = arith.constant 0 : index
    %c0_14 = arith.constant 0 : index
    %14 = vector.load %arg22[%c0_13, %c0_14] : memref<32x4xf32, #tpu.memory_space<vmem>>, vector<32x4xf32>
    tpu.vector_store %arg22[%c0_13, %c0_14], %13 {strides = array<i32>} : memref<32x4xf32, #tpu.memory_space<vmem>>, vector<32x4xf32>,
    %c0_i32_15 = arith.constant 0 : i32
    %15 = arith.cmpi eq, %arg0, %c0_i32_15 : i32
    %16 = arith.extui %15 : i1 to i32
    %c0_i32_16 = arith.constant 0 : i32
    %17 = arith.cmpi ne, %16, %c0_i32_16 : i32
    scf.if %17 {
      %c0_17 = arith.constant 0 : index
      %c0_18 = arith.constant 0 : index
      %18 = vector.load %arg4[%c0_17, %c0_18] : memref<32x1xf32, #tpu.memory_space<vmem>>, vector<32x1xf32>
      %cst_19 = arith.constant 1.000000e+00 : f32
      %19 = vector.broadcast %cst_19 : f32 to vector<32x1xf32>
      %20 = arith.divf %19, %18 : vector<32x1xf32>
      %c0_20 = arith.constant 0 : index
      %c0_21 = arith.constant 0 : index
      %21 = vector.load %arg22[%c0_20, %c0_21] : memref<32x4xf32, #tpu.memory_space<vmem>>, vector<32x4xf32>
      %22 = vector.broadcast %20 : vector<32x1xf32> to vector<32x4xf32>
      %23 = arith.mulf %21, %22 : vector<32x4xf32>
      %c0_22 = arith.constant 0 : index
      %c0_23 = arith.constant 0 : index
      %24 = vector.load %arg21[%c0_22, %c0_23] : memref<32x256xf32, #tpu.memory_space<vmem>>, vector<32x256xf32>
      %25 = vector.broadcast %20 : vector<32x1xf32> to vector<32x256xf32>
      %26 = arith.mulf %24, %25 : vector<32x256xf32>
      %27 = vector.extract_strided_slice %23 {offsets = [0, 0], sizes = [32, 2], strides = [1, 1]} : vector<32x4xf32> to vector<32x2xf32>
      %c0_24 = arith.constant 0 : index
      %c0_25 = arith.constant 0 : index
      %28 = vector.load %arg20[%c0_24, %c0_25] : memref<32x2xf32, #tpu.memory_space<vmem>>, vector<32x2xf32>
      tpu.vector_store %arg20[%c0_24, %c0_25], %27 {strides = array<i32>} : memref<32x2xf32, #tpu.memory_space<vmem>>, vector<32x2xf32>,
      %c0_26 = arith.constant 0 : index
      %c0_27 = arith.constant 0 : index
      %29 = vector.load %arg5[%c0_26, %c0_27] : memref<1x4xf32, #tpu.memory_space<vmem>>, vector<1x4xf32>
      %c0_28 = arith.constant 0 : index
      %c0_29 = arith.constant 0 : index
      %30 = vector.load %arg6[%c0_28, %c0_29] : memref<1x4xf32, #tpu.memory_space<vmem>>, vector<1x4xf32>
      %cst_30 = arith.constant dense<0.000000e+00> : vector<4xf32>
      %31 = vector.multi_reduction <add>, %23, %cst_30 [0] : vector<32x4xf32> to vector<4xf32>
      %32 = vector.shape_cast %31 : vector<4xf32> to vector<1x4xf32>
      %cst_31 = arith.constant 3.200000e+01 : f32
      %33 = vector.broadcast %cst_31 : f32 to vector<1x4xf32>
      %34 = arith.divf %32, %33 : vector<1x4xf32>
      %35 = vector.broadcast %34 : vector<1x4xf32> to vector<32x4xf32>
      %36 = arith.subf %23, %35 : vector<32x4xf32>
      %37 = arith.mulf %36, %36 : vector<32x4xf32>
      %cst_32 = arith.constant dense<0.000000e+00> : vector<4xf32>
      %38 = vector.multi_reduction <add>, %37, %cst_32 [0] : vector<32x4xf32> to vector<4xf32>
      %39 = vector.shape_cast %38 : vector<4xf32> to vector<1x4xf32>
      %cst_33 = arith.constant 3.200000e+01 : f32
      %40 = vector.broadcast %cst_33 : f32 to vector<1x4xf32>
      %41 = arith.divf %39, %40 : vector<1x4xf32>
      %cst_34 = arith.constant 9.99999974E-6 : f32
      %42 = vector.broadcast %cst_34 : f32 to vector<1x4xf32>
      %43 = arith.addf %41, %42 : vector<1x4xf32>
      %44 = math.rsqrt %43 : vector<1x4xf32>
      %45 = arith.mulf %29, %44 : vector<1x4xf32>
      %46 = vector.broadcast %34 : vector<1x4xf32> to vector<32x4xf32>
      %47 = arith.subf %23, %46 : vector<32x4xf32>
      %48 = vector.broadcast %45 : vector<1x4xf32> to vector<32x4xf32>
      %49 = arith.mulf %47, %48 : vector<32x4xf32>
      %50 = vector.broadcast %30 : vector<1x4xf32> to vector<32x4xf32>
      %51 = arith.addf %49, %50 : vector<32x4xf32>
      %c0_35 = arith.constant 0 : index
      %c0_36 = arith.constant 0 : index
      %52 = vector.load %arg7[%c0_35, %c0_36] : memref<4x32xf32, #tpu.memory_space<vmem>>, vector<4x32xf32>
      %cst_37 = arith.constant dense<0.000000e+00> : vector<32x32xf32>
      %53 = tpu.matmul %51, %52, %cst_37 {dimension_numbers = #tpu.dot_dimension_numbers<[1], [0], [0], [1], [0, 0, 1, 1], [], []>} : vector<32x4xf32>, vector<4x32xf32>, vector<32x32xf32> -> vector<32x32xf32>
      %c0_38 = arith.constant 0 : index
      %c0_39 = arith.constant 0 : index
      %54 = vector.load %arg8[%c0_38, %c0_39] : memref<1x32xf32, #tpu.memory_space<vmem>>, vector<1x32xf32>
      %55 = vector.broadcast %54 : vector<1x32xf32> to vector<32x32xf32>
      %56 = arith.addf %53, %55 : vector<32x32xf32>
      %c0_40 = arith.constant 0 : index
      %c0_41 = arith.constant 0 : index
      %57 = vector.load %arg9[%c0_40, %c0_41] : memref<32x64xf32, #tpu.memory_space<vmem>>, vector<32x64xf32>
      %cst_42 = arith.constant dense<0.000000e+00> : vector<32x64xf32>
      %58 = tpu.matmul %56, %57, %cst_42 {dimension_numbers = #tpu.dot_dimension_numbers<[1], [0], [0], [1], [0, 0, 1, 1], [], []>} : vector<32x32xf32>, vector<32x64xf32>, vector<32x64xf32> -> vector<32x64xf32>
      %c0_43 = arith.constant 0 : index
      %c0_44 = arith.constant 0 : index
      %59 = vector.load %arg10[%c0_43, %c0_44] : memref<1x64xf32, #tpu.memory_space<vmem>>, vector<1x64xf32>
      %60 = vector.broadcast %59 : vector<1x64xf32> to vector<32x64xf32>
      %61 = arith.addf %58, %60 : vector<32x64xf32>
      %cst_45 = arith.constant 0.000000e+00 : f32
      %62 = vector.broadcast %cst_45 : f32 to vector<32x64xf32>
      %63 = arith.maximumf %61, %62 : vector<32x64xf32>
      %c0_46 = arith.constant 0 : index
      %c0_47 = arith.constant 0 : index
      %64 = vector.load %arg11[%c0_46, %c0_47] : memref<1x256xf32, #tpu.memory_space<vmem>>, vector<1x256xf32>
      %c0_48 = arith.constant 0 : index
      %c0_49 = arith.constant 0 : index
      %65 = vector.load %arg12[%c0_48, %c0_49] : memref<1x256xf32, #tpu.memory_space<vmem>>, vector<1x256xf32>
      %cst_50 = arith.constant dense<0.000000e+00> : vector<256xf32>
      %66 = vector.multi_reduction <add>, %26, %cst_50 [0] : vector<32x256xf32> to vector<256xf32>
      %67 = vector.shape_cast %66 : vector<256xf32> to vector<1x256xf32>
      %cst_51 = arith.constant 3.200000e+01 : f32
      %68 = vector.broadcast %cst_51 : f32 to vector<1x256xf32>
      %69 = arith.divf %67, %68 : vector<1x256xf32>
      %70 = vector.broadcast %69 : vector<1x256xf32> to vector<32x256xf32>
      %71 = arith.subf %26, %70 : vector<32x256xf32>
      %72 = arith.mulf %71, %71 : vector<32x256xf32>
      %cst_52 = arith.constant dense<0.000000e+00> : vector<256xf32>
      %73 = vector.multi_reduction <add>, %72, %cst_52 [0] : vector<32x256xf32> to vector<256xf32>
      %74 = vector.shape_cast %73 : vector<256xf32> to vector<1x256xf32>
      %cst_53 = arith.constant 3.200000e+01 : f32
      %75 = vector.broadcast %cst_53 : f32 to vector<1x256xf32>
      %76 = arith.divf %74, %75 : vector<1x256xf32>
      %cst_54 = arith.constant 9.99999974E-6 : f32
      %77 = vector.broadcast %cst_54 : f32 to vector<1x256xf32>
      %78 = arith.addf %76, %77 : vector<1x256xf32>
      %79 = math.rsqrt %78 : vector<1x256xf32>
      %80 = arith.mulf %64, %79 : vector<1x256xf32>
      %81 = vector.broadcast %69 : vector<1x256xf32> to vector<32x256xf32>
      %82 = arith.subf %26, %81 : vector<32x256xf32>
      %83 = vector.broadcast %80 : vector<1x256xf32> to vector<32x256xf32>
      %84 = arith.mulf %82, %83 : vector<32x256xf32>
      %85 = vector.broadcast %65 : vector<1x256xf32> to vector<32x256xf32>
      %86 = arith.addf %84, %85 : vector<32x256xf32>
      %c0_55 = arith.constant 0 : index
      %c0_56 = arith.constant 0 : index
      %87 = vector.load %arg13[%c0_55, %c0_56] : memref<256x512xf32, #tpu.memory_space<vmem>>, vector<256x512xf32>
      %cst_57 = arith.constant dense<0.000000e+00> : vector<32x512xf32>
      %88 = tpu.matmul %86, %87, %cst_57 {dimension_numbers = #tpu.dot_dimension_numbers<[1], [0], [0], [1], [0, 0, 1, 1], [], []>} : vector<32x256xf32>, vector<256x512xf32>, vector<32x512xf32> -> vector<32x512xf32>
      %c0_58 = arith.constant 0 : index
      %c0_59 = arith.constant 0 : index
      %89 = vector.load %arg14[%c0_58, %c0_59] : memref<1x512xf32, #tpu.memory_space<vmem>>, vector<1x512xf32>
      %c0_60 = arith.constant 0 : index
      %c0_61 = arith.constant 0 : index
      %90 = vector.load %arg15[%c0_60, %c0_61] : memref<1x512xf32, #tpu.memory_space<vmem>>, vector<1x512xf32>
      %cst_62 = arith.constant dense<0.000000e+00> : vector<512xf32>
      %91 = vector.multi_reduction <add>, %88, %cst_62 [0] : vector<32x512xf32> to vector<512xf32>
      %92 = vector.shape_cast %91 : vector<512xf32> to vector<1x512xf32>
      %cst_63 = arith.constant 3.200000e+01 : f32
      %93 = vector.broadcast %cst_63 : f32 to vector<1x512xf32>
      %94 = arith.divf %92, %93 : vector<1x512xf32>
      %95 = vector.broadcast %94 : vector<1x512xf32> to vector<32x512xf32>
      %96 = arith.subf %88, %95 : vector<32x512xf32>
      %97 = arith.mulf %96, %96 : vector<32x512xf32>
      %cst_64 = arith.constant dense<0.000000e+00> : vector<512xf32>
      %98 = vector.multi_reduction <add>, %97, %cst_64 [0] : vector<32x512xf32> to vector<512xf32>
      %99 = vector.shape_cast %98 : vector<512xf32> to vector<1x512xf32>
      %cst_65 = arith.constant 3.200000e+01 : f32
      %100 = vector.broadcast %cst_65 : f32 to vector<1x512xf32>
      %101 = arith.divf %99, %100 : vector<1x512xf32>
      %cst_66 = arith.constant 9.99999974E-6 : f32
      %102 = vector.broadcast %cst_66 : f32 to vector<1x512xf32>
      %103 = arith.addf %101, %102 : vector<1x512xf32>
      %104 = math.rsqrt %103 : vector<1x512xf32>
      %105 = arith.mulf %89, %104 : vector<1x512xf32>
      %106 = vector.broadcast %94 : vector<1x512xf32> to vector<32x512xf32>
      %107 = arith.subf %88, %106 : vector<32x512xf32>
      %108 = vector.broadcast %105 : vector<1x512xf32> to vector<32x512xf32>
      %109 = arith.mulf %107, %108 : vector<32x512xf32>
      %110 = vector.broadcast %90 : vector<1x512xf32> to vector<32x512xf32>
      %111 = arith.addf %109, %110 : vector<32x512xf32>
      %cst_67 = arith.constant 0.000000e+00 : f32
      %112 = vector.broadcast %cst_67 : f32 to vector<32x512xf32>
      %113 = arith.maximumf %111, %112 : vector<32x512xf32>
      %c0_68 = arith.constant 0 : index
      %c0_69 = arith.constant 0 : index
      %114 = vector.load %arg16[%c0_68, %c0_69] : memref<64x256xf32, #tpu.memory_space<vmem>>, vector<64x256xf32>
      %cst_70 = arith.constant dense<0.000000e+00> : vector<32x256xf32>
      %115 = tpu.matmul %63, %114, %cst_70 {dimension_numbers = #tpu.dot_dimension_numbers<[1], [0], [0], [1], [0, 0, 1, 1], [], []>} : vector<32x64xf32>, vector<64x256xf32>, vector<32x256xf32> -> vector<32x256xf32>
      %c0_71 = arith.constant 0 : index
      %c0_72 = arith.constant 0 : index
      %116 = vector.load %arg17[%c0_71, %c0_72] : memref<512x256xf32, #tpu.memory_space<vmem>>, vector<512x256xf32>
      %cst_73 = arith.constant dense<0.000000e+00> : vector<32x256xf32>
      %117 = tpu.matmul %113, %116, %cst_73 {dimension_numbers = #tpu.dot_dimension_numbers<[1], [0], [0], [1], [0, 0, 1, 1], [], []>} : vector<32x512xf32>, vector<512x256xf32>, vector<32x256xf32> -> vector<32x256xf32>
      %118 = arith.addf %115, %117 : vector<32x256xf32>
      %c0_74 = arith.constant 0 : index
      %c0_75 = arith.constant 0 : index
      %119 = vector.load %arg18[%c0_74, %c0_75] : memref<1x256xf32, #tpu.memory_space<vmem>>, vector<1x256xf32>
      %120 = vector.broadcast %119 : vector<1x256xf32> to vector<32x256xf32>
      %121 = arith.addf %118, %120 : vector<32x256xf32>
      %c0_76 = arith.constant 0 : index
      %c0_77 = arith.constant 0 : index
      %122 = vector.load %arg19[%c0_76, %c0_77] : memref<32x256xf32, #tpu.memory_space<vmem>>, vector<32x256xf32>
      tpu.vector_store %arg19[%c0_76, %c0_77], %121 {strides = array<i32>} : memref<32x256xf32, #tpu.memory_space<vmem>>, vector<32x256xf32>,
    } else {
    }
    return
  }
  func.func @transform_0(%arg0: i32) -> (i32, i32) {
    %c0_i32 = arith.constant 0 : i32
    %c0_i32_0 = arith.constant 0 : i32
    return %c0_i32, %arg0 : i32, i32
  }
  func.func @transform_1(%arg0: i32) -> (i32, i32) {
    %c0_i32 = arith.constant 0 : i32
    %c0_i32_0 = arith.constant 0 : i32
    return %arg0, %c0_i32 : i32, i32
  }
  func.func @transform_2(%arg0: i32) -> (i32, i32) {
    %c0_i32 = arith.constant 0 : i32
    %c0_i32_0 = arith.constant 0 : i32
    return %arg0, %c0_i32 : i32, i32
  }
  func.func @transform_3(%arg0: i32) -> (i32, i32) {
    %c0_i32 = arith.constant 0 : i32
    %c0_i32_0 = arith.constant 0 : i32
    %c0_i32_1 = arith.constant 0 : i32
    return %c0_i32, %c0_i32_0 : i32, i32
  }
  func.func @transform_4(%arg0: i32) -> (i32, i32) {
    %c0_i32 = arith.constant 0 : i32
    %c0_i32_0 = arith.constant 0 : i32
    %c0_i32_1 = arith.constant 0 : i32
    return %c0_i32, %c0_i32_0 : i32, i32
  }
  func.func @transform_5(%arg0: i32) -> (i32, i32) {
    %c0_i32 = arith.constant 0 : i32
    %c0_i32_0 = arith.constant 0 : i32
    %c0_i32_1 = arith.constant 0 : i32
    return %c0_i32, %c0_i32_0 : i32, i32
  }
  func.func @transform_6(%arg0: i32) -> (i32, i32) {
    %c0_i32 = arith.constant 0 : i32
    %c0_i32_0 = arith.constant 0 : i32
    %c0_i32_1 = arith.constant 0 : i32
    return %c0_i32, %c0_i32_0 : i32, i32
  }
  func.func @transform_7(%arg0: i32) -> (i32, i32) {
    %c0_i32 = arith.constant 0 : i32
    %c0_i32_0 = arith.constant 0 : i32
    %c0_i32_1 = arith.constant 0 : i32
    return %c0_i32, %c0_i32_0 : i32, i32
  }
  func.func @transform_8(%arg0: i32) -> (i32, i32) {
    %c0_i32 = arith.constant 0 : i32
    %c0_i32_0 = arith.constant 0 : i32
    %c0_i32_1 = arith.constant 0 : i32
    return %c0_i32, %c0_i32_0 : i32, i32
  }
  func.func @transform_9(%arg0: i32) -> (i32, i32) {
    %c0_i32 = arith.constant 0 : i32
    %c0_i32_0 = arith.constant 0 : i32
    %c0_i32_1 = arith.constant 0 : i32
    return %c0_i32, %c0_i32_0 : i32, i32
  }
  func.func @transform_10(%arg0: i32) -> (i32, i32) {
    %c0_i32 = arith.constant 0 : i32
    %c0_i32_0 = arith.constant 0 : i32
    %c0_i32_1 = arith.constant 0 : i32
    return %c0_i32, %c0_i32_0 : i32, i32
  }
  func.func @transform_11(%arg0: i32) -> (i32, i32) {
    %c0_i32 = arith.constant 0 : i32
    %c0_i32_0 = arith.constant 0 : i32
    %c0_i32_1 = arith.constant 0 : i32
    return %c0_i32, %c0_i32_0 : i32, i32
  }
  func.func @transform_12(%arg0: i32) -> (i32, i32) {
    %c0_i32 = arith.constant 0 : i32
    %c0_i32_0 = arith.constant 0 : i32
    %c0_i32_1 = arith.constant 0 : i32
    return %c0_i32, %c0_i32_0 : i32, i32
  }
  func.func @transform_13(%arg0: i32) -> (i32, i32) {
    %c0_i32 = arith.constant 0 : i32
    %c0_i32_0 = arith.constant 0 : i32
    %c0_i32_1 = arith.constant 0 : i32
    return %c0_i32, %c0_i32_0 : i32, i32
  }
  func.func @transform_14(%arg0: i32) -> (i32, i32) {
    %c0_i32 = arith.constant 0 : i32
    %c0_i32_0 = arith.constant 0 : i32
    %c0_i32_1 = arith.constant 0 : i32
    return %c0_i32, %c0_i32_0 : i32, i32
  }
  func.func @transform_15(%arg0: i32) -> (i32, i32) {
    %c0_i32 = arith.constant 0 : i32
    %c0_i32_0 = arith.constant 0 : i32
    %c0_i32_1 = arith.constant 0 : i32
    return %c0_i32, %c0_i32_0 : i32, i32
  }
  func.func @transform_16(%arg0: i32) -> (i32, i32) {
    %c0_i32 = arith.constant 0 : i32
    %c0_i32_0 = arith.constant 0 : i32
    %c0_i32_1 = arith.constant 0 : i32
    return %c0_i32, %c0_i32_0 : i32, i32
  }
  func.func @transform_17(%arg0: i32) -> (i32, i32) {
    %c0_i32 = arith.constant 0 : i32
    %c0_i32_0 = arith.constant 0 : i32
    %c0_i32_1 = arith.constant 0 : i32
    return %c0_i32, %c0_i32_0 : i32, i32
  }
  func.func @transform_18(%arg0: i32) -> (i32, i32) {
    %c0_i32 = arith.constant 0 : i32
    %c0_i32_0 = arith.constant 0 : i32
    %c0_i32_1 = arith.constant 0 : i32
    return %c0_i32, %c0_i32_0 : i32, i32
  }
  func.func @transform_19(%arg0: i32) -> (i32, i32) {
    %c0_i32 = arith.constant 0 : i32
    %c0_i32_0 = arith.constant 0 : i32
    %c0_i32_1 = arith.constant 0 : i32
    return %c0_i32, %c0_i32_0 : i32, i32
  }
}

</mosaic_0001>

<bundles_post_ra>
// kernel: tpu_custom_call.1
= control target key start
LH: loop header
LB: loop body
LE: loop exit
PB: predicated region body
PF: predicated region fallthrough
CT: control target
= control target key end

     0   :  { %s3982_s0 = inlined_call_operand.hbm [shape: bf16[32,512], index: 0, kind: input, shape index: {}]   ;;  %s3983_s1 = inlined_call_operand.vmem [shape: bf16[512,256], index: 1, kind: input, shape index: {}]   ;;  %s3984_s2 = inlined_call_operand.vmem [shape: f32[512,4], index: 2, kind: input, shape index: {}]   ;;  %s3985_s3 = inlined_call_operand.vmem [shape: f32[32,1], index: 3, kind: input, shape index: {}]   ;;  %s3986_s4 = inlined_call_operand.hbm [shape: f32[1,4], index: 4, kind: input, shape index: {}]   ;;  %s3987_s5 = inlined_call_operand.hbm [shape: f32[1,4], index: 5, kind: input, shape index: {}]   ;;  %s3988_s6 = inlined_call_operand.vmem [shape: f32[4,32], index: 6, kind: input, shape index: {}]   ;;  %s3989_s7 = inlined_call_operand.hbm [shape: f32[1,32], index: 7, kind: input, shape index: {}]   ;;  %s3990_s8 = inlined_call_operand.vmem [shape: f32[32,64], index: 8, kind: input, shape index: {}]   ;;  %s3991_s9 = inlined_call_operand.vmem [shape: f32[1,64], index: 9, kind: input, shape index: {}]   ;;  %s3992_s10 = inlined_call_operand.vmem [shape: f32[1,256], index: 10, kind: input, shape index: {}]   ;;  %s3993_s11 = inlined_call_operand.hbm [shape: f32[1,256], index: 11, kind: input, shape index: {}]   ;;  %s3994_s12 = inlined_call_operand.hbm [shape: f32[256,512], index: 12, kind: input, shape index: {}]   ;;  %s3995_s13 = inlined_call_operand.vmem [shape: f32[1,512], index: 13, kind: input, shape index: {}]   ;;  %s3996_s14 = inlined_call_operand.vmem [shape: f32[1,512], index: 14, kind: input, shape index: {}]   ;;  %s3997_s15 = inlined_call_operand.hbm [shape: f32[64,256], index: 15, kind: input, shape index: {}]   ;;  %s3998_s16 = inlined_call_operand.hbm [shape: f32[512,256], index: 16, kind: input, shape index: {}]   ;;  %s3999_s17 = inlined_call_operand.vmem [shape: f32[1,256], index: 17, kind: input, shape index: {}]   ;;  %s4000_s18 = inlined_call_operand.hbm [shape: f32[32,256], index: 18, kind: output, shape index: {0}]   ;;  %s4001_s19 = inlined_call_operand.vmem [shape: f32[32,2], index: 19, kind: output, shape index: {1}]  }
   0x1   :  { %4005 = sst [smem:[#allocation25_spill]] %s3982_s0 }
   0x2   :  { %4006 = sst [smem:[#allocation26_spill]] %s3983_s1 }
   0x3   :  { %4007 = sst [smem:[#allocation27_spill]] %s3984_s2 }
   0x4   :  { %4008 = sst [smem:[#allocation28_spill]] %s3985_s3 }
   0x5   :  { %25 = vsyncpa [#allocation5], 0 }
   0x6   :  { %26 = vsyncpa [#allocation8], 0 }
   0x7   :  { %27 = vsyncpa [#allocation11], 0 }
   0x8   :  { %28 = vsyncpa [#allocation14], 0 }
   0x9   :  { %29 = vsyncpa [#allocation17], 0 }
   0xa   :  { %30 = vsyncpa [#allocation6], 0  ;;  %s3044_s0 = smov [#allocation7]   ;;  %s3045_s20 = smov [#allocation10]  }
   0xb   :  { %s55_s30 = sshll.u32 %s3044_s0, 4  ;;  %s77_s21 = sshll.u32 %s3045_s20, 4  ;;  %s56_s30 = int_to_ptr.vmem [resolvable:$true] %s55_s30  ;;  %s78_s21 = int_to_ptr.vmem [resolvable:$true] %s77_s21 }
   0xc   :  { %s2860_s1 = scalar_lea.vmem %s56_s30, 16  ;;  %s2864_s22 = scalar_lea.vmem %s56_s30, 32 }
   0xd   :  { %p2861_p0 = scmp.ne.s32.totalorder %s56_s30, %s2860_s1  ;;  %p2865_p1 = scmp.lt.s32.totalorder %s56_s30, %s56_s30 }
   0xe   :  { %p2866_p2 = scmp.lt.s32.totalorder %s2864_s22, %s2860_s1 }
  0x10   :  { %p2867_p3 = por %p2866_p2, %p2865_p1 }
  0x12   :  { %p2868_p4 = pnand %p2867_p3, %p2861_p0 }
  0x14   :  { %2871 = shalt.err (!%p2868_p4)
}
  0x15   :  { %58 = dma.hbm_to_vmem [thread:$0]  %s3986_s4, 16, %s56_s30, [#allocation8]  }
  0x16   :  { %s2880_s24 = scalar_lea.vmem %s78_s21, 16  ;;  %s2884_s25 = scalar_lea.vmem %s78_s21, 32 }
  0x17   :  { %p2881_p5 = scmp.ne.s32.totalorder %s78_s21, %s2880_s24  ;;  %p2885_p6 = scmp.lt.s32.totalorder %s78_s21, %s78_s21 }
  0x18   :  { %p2886_p7 = scmp.lt.s32.totalorder %s2884_s25, %s2880_s24 }
  0x1a   :  { %p2887_p8 = por %p2886_p7, %p2885_p6 }
  0x1c   :  { %p2888_p9 = pnand %p2887_p8, %p2881_p5 }
  0x1e   :  { %2891 = shalt.err (!%p2888_p9)
}
  0x1f   :  { %80 = dma.hbm_to_vmem [thread:$0]  %s3989_s7, 16, %s78_s21, [#allocation11]  }
  0x20   :  { %s3046_s27 = smov [#allocation13]  }
  0x21   :  { %s102_s28 = sshll.u32 %s3046_s27, 4  ;;  %s103_s28 = int_to_ptr.vmem [resolvable:$true] %s102_s28 }
  0x22   :  { %s2900_s29 = scalar_lea.vmem %s103_s28, 16384  ;;  %p2905_p11 = scmp.lt.s32.totalorder %s103_s28, %s103_s28 }
  0x23   :  { %p2901_p10 = scmp.ne.s32.totalorder %s103_s28, %s2900_s29  ;;  %p2906_p12 = scmp.lt.s32.totalorder %s2900_s29, %s2900_s29 }
  0x25   :  { %p2907_p13 = por %p2906_p12, %p2905_p11 }
  0x27   :  { %p2908_p0 = pnand %p2907_p13, %p2901_p10 }
  0x29   :  { %2911 = shalt.err (!%p2908_p0)
}
  0x2a   :  { %s3047_s4 = smov 512   ;;  %s3048_s0 = smov 32  }
  0x2b   :  { %108 = dma.hbm_to_vmem [thread:$0]  %s3994_s12, 16384, %s103_s28, [#allocation14], %s3047_s4, %s3047_s4, %s3048_s0  }
  0x2c   :  { %s3049_s1 = smov [#allocation4]  }
  0x2d   :  { %s36_s22 = sshll.u32 %s3049_s1, 4  ;;  %s37_s22 = int_to_ptr.vmem [resolvable:$true] %s36_s22 }
  0x2e   :  { %s2920_s7 = scalar_lea.vmem %s37_s22, 1024  ;;  %p2925_p2 = scmp.lt.s32.totalorder %s37_s22, %s37_s22 }
  0x2f   :  { %p2921_p1 = scmp.ne.s32.totalorder %s37_s22, %s2920_s7  ;;  %p2926_p3 = scmp.lt.s32.totalorder %s2920_s7, %s2920_s7 }
  0x31   :  { %p2927_p4 = por %p2926_p3, %p2925_p2 }
  0x33   :  { %p2928_p5 = pnand %p2927_p4, %p2921_p1 }
  0x35   :  { %2931 = shalt.err (!%p2928_p5)
}
  0x36   :  { %s3050_s21 = smov 256   ;;  %s3051_s2 = smov 16  }
  0x37   :  { %s4009_s25 = sld [smem:[#allocation25_spill]]  ;;  %s3052_s12 = smov [#allocation9]  }
  0x38   :  { %s65_s3 = sshll.u32 %s3052_s12, 4  ;;  %s3053_s26 = smov [#allocation12]   ;;  %s66_s3 = int_to_ptr.vmem [resolvable:$true] %s65_s3 }
  0x39   :  { %s93_s27 = sshll.u32 %s3053_s26, 4  ;;  %s2940_s28 = scalar_lea.vmem %s66_s3, 16  ;;  %s94_s27 = int_to_ptr.vmem [resolvable:$true] %s93_s27 }
  0x3a   :  { %p2941_p6 = scmp.ne.s32.totalorder %s66_s3, %s2940_s28  ;;  %s2944_s29 = scalar_lea.vmem %s66_s3, 32 }
  0x3b   :  { %p2945_p7 = scmp.lt.s32.totalorder %s66_s3, %s66_s3  ;;  %p2946_p8 = scmp.lt.s32.totalorder %s2944_s29, %s2940_s28 }
  0x3d   :  { %42 = dma.hbm_to_vmem [thread:$0]  %s4009_s25, 1024, %s37_s22, [#allocation5], %s3050_s21, %s3050_s21, %s3051_s2  }
  0x3e   :  { %p2947_p9 = por %p2946_p8, %p2945_p7 }
  0x40   :  { %p2948_p10 = pnand %p2947_p9, %p2941_p6 }
  0x42   :  { %2951 = shalt.err (!%p2948_p10)
}
  0x43   :  { %68 = dma.hbm_to_vmem [thread:$0]  %s3987_s5, 16, %s66_s3, [#allocation8]  }
  0x44   :  { %s2960_s30 = scalar_lea.vmem %s94_s27, 32  ;;  %p2965_p12 = scmp.lt.s32.totalorder %s94_s27, %s94_s27 }
  0x45   :  { %p2961_p11 = scmp.ne.s32.totalorder %s94_s27, %s2960_s30  ;;  %p2966_p13 = scmp.lt.s32.totalorder %s2960_s30, %s2960_s30 }
  0x47   :  { %p2967_p0 = por %p2966_p13, %p2965_p12 }
  0x49   :  { %p2968_p1 = pnand %p2967_p0, %p2961_p11 }
  0x4b   :  { %2971 = shalt.err (!%p2968_p1)
}
  0x4c   :  { %96 = dma.hbm_to_vmem [thread:$0]  %s3993_s11, 32, %s94_s27, [#allocation11]  }
  0x4d   :  { %s3054_s22 = smov [#allocation15]   ;;  %s3055_s23 = smov [#allocation16]  }
  0x4e   :  { %s118_s7 = sshll.u32 %s3054_s22, 4  ;;  %s130_s24 = sshll.u32 %s3055_s23, 4  ;;  %s119_s7 = int_to_ptr.vmem [resolvable:$true] %s118_s7  ;;  %s131_s24 = int_to_ptr.vmem [resolvable:$true] %s130_s24 }
  0x4f   :  { %s2980_s25 = scalar_lea.vmem %s119_s7, 2048  ;;  %p2985_p3 = scmp.lt.s32.totalorder %s119_s7, %s119_s7 }
  0x50   :  { %p2981_p2 = scmp.ne.s32.totalorder %s119_s7, %s2980_s25  ;;  %p2986_p4 = scmp.lt.s32.totalorder %s2980_s25, %s2980_s25 }
  0x52   :  { %p2987_p5 = por %p2986_p4, %p2985_p3 }
  0x54   :  { %p2988_p6 = pnand %p2987_p5, %p2981_p2 }
  0x56   :  { %2991 = shalt.err (!%p2988_p6)
}
  0x57   :  { %124 = dma.hbm_to_vmem [thread:$0]  %s3997_s15, 2048, %s119_s7, [#allocation14], %s3050_s21, %s3050_s21, %s3051_s2  }
  0x58   :  { %s3000_s11 = scalar_lea.vmem %s131_s24, 16384  ;;  %p3005_p8 = scmp.lt.s32.totalorder %s131_s24, %s131_s24 }
  0x59   :  { %p3001_p7 = scmp.ne.s32.totalorder %s131_s24, %s3000_s11  ;;  %p3006_p9 = scmp.lt.s32.totalorder %s3000_s11, %s3000_s11 }
  0x5b   :  { %p3007_p10 = por %p3006_p9, %p3005_p8 }
  0x5d   :  { %p3008_p11 = pnand %p3007_p10, %p3001_p7 }
  0x5f   :  { %3011 = shalt.err (!%p3008_p11)
}
  0x60   :  { %136 = dma.hbm_to_vmem [thread:$0]  %s3998_s16, 16384, %s131_s24, [#allocation17], %s3050_s21, %s3050_s21, %s3051_s2  }
  0x61   :  { %3032 = dma.done.wait [#allocation5], 1024  }
  0x62   :  { %3033 = vsyncadd [#allocation5], 4294966272 }
  0x63   :  { %3034 = dma.done.wait [#allocation8], 32  }
  0x64   :  { %3035 = vsyncadd [#allocation8], 4294967264 }
  0x65   :  { %3036 = dma.done.wait [#allocation11], 48  }
  0x66   :  { %3037 = vsyncadd [#allocation11], 4294967248 }
  0x67   :  { %3038 = dma.done.wait [#allocation14], 18432  }
  0x68   :  { %3039 = vsyncadd [#allocation14], 4294948864 }
  0x69   :  { %3040 = dma.done.wait [#allocation17], 16384  }
  0x6a   :  { %3041 = vsyncadd [#allocation17], 4294950912  ;;  %v3056_v0 = vmov 0   ;;  %s4010_s28 = sld [smem:[#allocation26_spill]]  ;;  %v3331_v47 = vld [vmem:[#allocation4] sm:$0xff]  ;;  %v3333_v48 = vld [vmem:[#allocation4 + $0x10] sm:$0xff] }
  0x6b   :  { %2724 = vset.pattern.permute.xlu0 %v3056_v0  ;;  %2725 = vset.pattern.permute.xlu1 %v3056_v0  ;;  %v3335_v49 = vld [vmem:[#allocation4 + $0x8] sm:$0xff]  ;;  %v3337_v50 = vld [vmem:[#allocation4 + $0x18] sm:$0xff]  ;;  %v2498_v53 = vcombine.high %v3331_v47, %v3333_v48  ;;  %s4011_s11 = sld [smem:[#allocation27_spill]]  ;;  %vm175_vm0 = vcmask 31744   ;;  %vm1151_vm1 = vcmask 1043456   ;;  %vm1064_vm2 = vcmask 15360  }
  0x6c   :  { %v2500_v54 = vcombine.high %v3335_v49, %v3337_v50  ;;  %s4012_s3 = sld [smem:[#allocation28_spill]]  ;;  %vm1251_vm3 = vcmask 261120   ;;  %vm2342_vm4 = vcmask 523264  }
  0x6d   :  { %652 = vmatprep.mubr.bf16.mxu0 %v2498_v53 }
  0x6e   :  { %705 = vmatprep.mubr.bf16.mxu1 %v2500_v54 }
  0x70   :  { %v2726_v1 = vld [vmem:[%s4010_s28 + $0x74] ss:$8 sps:$4 sm:$0xff]   ;;  %v2730_v3 = vld [vmem:[%s4010_s28 + $0x70] ss:$8 sps:$4 sm:$0xff]   ;;  %v2732_v5 = vld [vmem:[%s4010_s28 + $0x64] ss:$8 sps:$4 sm:$0xff]  }
  0x71   :  { %v2728_v2 = vld [vmem:[%s4010_s28 + $0x174] ss:$8 sps:$4 sm:$0xff]   ;;  %620 = vmatprep.subr.bf16.mxu0 %v2726_v1  ;;  %v2731_v4 = vld [vmem:[%s4010_s28 + $0x170] ss:$8 sps:$4 sm:$0xff]   ;;  %v2734_v6 = vld [vmem:[%s4010_s28 + $0x164] ss:$8 sps:$4 sm:$0xff]  }
  0x72   :  { %673 = vmatprep.subr.bf16.mxu1 %v2728_v2  ;;  %621 = vmatpush1.bf16.msra.mxu0 %v2730_v3  ;;  %v2736_v7 = vld [vmem:[%s4010_s28 + $0x60] ss:$8 sps:$4 sm:$0xff]   ;;  %v2738_v9 = vld [vmem:[%s4010_s28 + $0x54] ss:$8 sps:$4 sm:$0xff]   ;;  %v2742_v11 = vld [vmem:[%s4010_s28 + $0x50] ss:$8 sps:$4 sm:$0xff]  }
  0x73   :  { %674 = vmatpush1.bf16.msra.mxu1 %v2731_v4  ;;  %622 = vmatprep.subr.bf16.mxu0 %v2732_v5  ;;  %v2737_v8 = vld [vmem:[%s4010_s28 + $0x160] ss:$8 sps:$4 sm:$0xff]   ;;  %v2740_v10 = vld [vmem:[%s4010_s28 + $0x154] ss:$8 sps:$4 sm:$0xff]   ;;  %v2743_v12 = vld [vmem:[%s4010_s28 + $0x150] ss:$8 sps:$4 sm:$0xff]  }
  0x74   :  { %675 = vmatprep.subr.bf16.mxu1 %v2734_v6  ;;  %v2744_v13 = vld [vmem:[%s4010_s28 + $0x44] ss:$8 sps:$4 sm:$0xff]   ;;  %v2748_v15 = vld [vmem:[%s4010_s28 + $0x40] ss:$8 sps:$4 sm:$0xff]   ;;  %v2750_v17 = vld [vmem:[%s4010_s28 + $0x34] ss:$8 sps:$4 sm:$0xff]  }
  0x75   :  { %v2746_v14 = vld [vmem:[%s4010_s28 + $0x144] ss:$8 sps:$4 sm:$0xff]   ;;  %v2749_v16 = vld [vmem:[%s4010_s28 + $0x140] ss:$8 sps:$4 sm:$0xff]   ;;  %v2752_v18 = vld [vmem:[%s4010_s28 + $0x134] ss:$8 sps:$4 sm:$0xff]  }
  0x76   :  { %623 = vmatpush1.bf16.msra.mxu0 %v2736_v7  ;;  %v2754_v19 = vld [vmem:[%s4010_s28 + $0x30] ss:$8 sps:$4 sm:$0xff]   ;;  %v2756_v21 = vld [vmem:[%s4010_s28 + $0x24] ss:$8 sps:$4 sm:$0xff]   ;;  %v2760_v23 = vld [vmem:[%s4010_s28 + $0x20] ss:$8 sps:$4 sm:$0xff]  }
  0x77   :  { %676 = vmatpush1.bf16.msra.mxu1 %v2737_v8  ;;  %624 = vmatprep.subr.bf16.mxu0 %v2738_v9  ;;  %v2755_v20 = vld [vmem:[%s4010_s28 + $0x130] ss:$8 sps:$4 sm:$0xff]   ;;  %v2758_v22 = vld [vmem:[%s4010_s28 + $0x124] ss:$8 sps:$4 sm:$0xff]   ;;  %v2761_v24 = vld [vmem:[%s4010_s28 + $0x120] ss:$8 sps:$4 sm:$0xff]   ;;  %v2497_v9 = vcombine.low %v3331_v47, %v3333_v48 }
  0x78   :  { %677 = vmatprep.subr.bf16.mxu1 %v2740_v10  ;;  %v2762_v25 = vld [vmem:[%s4010_s28 + $0x14] ss:$8 sps:$4 sm:$0xff]   ;;  %v2766_v27 = vld [vmem:[%s4010_s28 + $0x10] ss:$8 sps:$4 sm:$0xff]   ;;  %v2768_v29 = vld [vmem:[%s4010_s28 + $0x4] ss:$8 sps:$4 sm:$0xff]   ;;  %v2499_v10 = vcombine.low %v3335_v49, %v3337_v50 }
  0x79   :  { %v2764_v26 = vld [vmem:[%s4010_s28 + $0x114] ss:$8 sps:$4 sm:$0xff]   ;;  %v2767_v28 = vld [vmem:[%s4010_s28 + $0x110] ss:$8 sps:$4 sm:$0xff]   ;;  %v2770_v30 = vld [vmem:[%s4010_s28 + $0x104] ss:$8 sps:$4 sm:$0xff]  }
  0x7a   :  { %625 = vmatpush1.bf16.msra.mxu0 %v2742_v11  ;;  %v2772_v31 = vld [vmem:[%s4010_s28] ss:$8 sps:$4 sm:$0xff]   ;;  %v2774_v33 = vld [vmem:[%s4010_s28 + $0xf4] ss:$8 sps:$4 sm:$0xff]   ;;  %v2778_v35 = vld [vmem:[%s4010_s28 + $0xf0] ss:$8 sps:$4 sm:$0xff]  }
  0x7b   :  { %678 = vmatpush1.bf16.msra.mxu1 %v2743_v12  ;;  %626 = vmatprep.subr.bf16.mxu0 %v2744_v13  ;;  %v2773_v32 = vld [vmem:[%s4010_s28 + $0x100] ss:$8 sps:$4 sm:$0xff]   ;;  %v2776_v34 = vld [vmem:[%s4010_s28 + $0x1f4] ss:$8 sps:$4 sm:$0xff]   ;;  %v2779_v36 = vld [vmem:[%s4010_s28 + $0x1f0] ss:$8 sps:$4 sm:$0xff]  }
  0x7c   :  { %679 = vmatprep.subr.bf16.mxu1 %v2746_v14  ;;  %v2780_v37 = vld [vmem:[%s4010_s28 + $0xe4] ss:$8 sps:$4 sm:$0xff]   ;;  %v2784_v39 = vld [vmem:[%s4010_s28 + $0xe0] ss:$8 sps:$4 sm:$0xff]   ;;  %v2786_v41 = vld [vmem:[%s4010_s28 + $0xd4] ss:$8 sps:$4 sm:$0xff]  }
  0x7d   :  { %v2782_v38 = vld [vmem:[%s4010_s28 + $0x1e4] ss:$8 sps:$4 sm:$0xff]   ;;  %v2785_v40 = vld [vmem:[%s4010_s28 + $0x1e0] ss:$8 sps:$4 sm:$0xff]   ;;  %v2788_v42 = vld [vmem:[%s4010_s28 + $0x1d4] ss:$8 sps:$4 sm:$0xff]  }
  0x7e   :  { %627 = vmatpush1.bf16.msra.mxu0 %v2748_v15  ;;  %v2790_v43 = vld [vmem:[%s4010_s28 + $0xd0] ss:$8 sps:$4 sm:$0xff]   ;;  %v2792_v45 = vld [vmem:[%s4010_s28 + $0xc4] ss:$8 sps:$4 sm:$0xff]   ;;  %v2796_v51 = vld [vmem:[%s4010_s28 + $0xc0] ss:$8 sps:$4 sm:$0xff]  }
  0x7f   :  { %680 = vmatpush1.bf16.msra.mxu1 %v2749_v16  ;;  %628 = vmatprep.subr.bf16.mxu0 %v2750_v17  ;;  %v2791_v44 = vld [vmem:[%s4010_s28 + $0x1d0] ss:$8 sps:$4 sm:$0xff]   ;;  %v2794_v46 = vld [vmem:[%s4010_s28 + $0x1c4] ss:$8 sps:$4 sm:$0xff]   ;;  %v2797_v52 = vld [vmem:[%s4010_s28 + $0x1c0] ss:$8 sps:$4 sm:$0xff]  }
  0x80   :  { %681 = vmatprep.subr.bf16.mxu1 %v2752_v18  ;;  %v2798_v55 = vld [vmem:[%s4010_s28 + $0xb4] ss:$8 sps:$4 sm:$0xff]   ;;  %v2802_v57 = vld [vmem:[%s4010_s28 + $0xb0] ss:$8 sps:$4 sm:$0xff]   ;;  %v2804_v59 = vld [vmem:[%s4010_s28 + $0xa4] ss:$8 sps:$4 sm:$0xff]  }
  0x81   :  { %v2800_v56 = vld [vmem:[%s4010_s28 + $0x1b4] ss:$8 sps:$4 sm:$0xff]   ;;  %v2803_v58 = vld [vmem:[%s4010_s28 + $0x1b0] ss:$8 sps:$4 sm:$0xff]   ;;  %v2806_v60 = vld [vmem:[%s4010_s28 + $0x1a4] ss:$8 sps:$4 sm:$0xff]  }
  0x82   :  { %629 = vmatpush1.bf16.msra.mxu0 %v2754_v19  ;;  %v2808_v61 = vld [vmem:[%s4010_s28 + $0xa0] ss:$8 sps:$4 sm:$0xff]   ;;  %v2810_v63 = vld [vmem:[%s4010_s28 + $0x94] ss:$8 sps:$4 sm:$0xff]   ;;  %v2814_v1 = vld [vmem:[%s4010_s28 + $0x90] ss:$8 sps:$4 sm:$0xff]  }
  0x83   :  { %682 = vmatpush1.bf16.msra.mxu1 %v2755_v20  ;;  %630 = vmatprep.subr.bf16.mxu0 %v2756_v21  ;;  %v2809_v62 = vld [vmem:[%s4010_s28 + $0x1a0] ss:$8 sps:$4 sm:$0xff]   ;;  %v2812_v0 = vld [vmem:[%s4010_s28 + $0x194] ss:$8 sps:$4 sm:$0xff]   ;;  %v2815_v2 = vld [vmem:[%s4010_s28 + $0x190] ss:$8 sps:$4 sm:$0xff]  }
  0x84   :  { %683 = vmatprep.subr.bf16.mxu1 %v2758_v22  ;;  %v2816_v3 = vld [vmem:[%s4010_s28 + $0x84] ss:$8 sps:$4 sm:$0xff]   ;;  %v2820_v5 = vld [vmem:[%s4010_s28 + $0x80] ss:$8 sps:$4 sm:$0xff]   ;;  %v793_v7 = vld [vmem:[%s4011_s11 + $0xf8] sm:$0xff] }
  0x85   :  { %v2818_v4 = vld [vmem:[%s4010_s28 + $0x184] ss:$8 sps:$4 sm:$0xff]   ;;  %v2821_v6 = vld [vmem:[%s4010_s28 + $0x180] ss:$8 sps:$4 sm:$0xff]   ;;  %v825_v8 = vld [vmem:[%s4011_s11 + $0x1f8] sm:$0xff] }
  0x86   :  { %631 = vmatpush1.bf16.msra.mxu0 %v2760_v23  ;;  %v777_v11 = vld [vmem:[%s4011_s11 + $0x78] sm:$0xff]  ;;  %v792_v13 = vld [vmem:[%s4011_s11 + $0xf0] sm:$0xff]  ;;  %v3425_v17 = vld [vmem:[#allocation4 + $0x20] sm:$0xff] }
  0x87   :  { %684 = vmatpush1.bf16.msra.mxu1 %v2761_v24  ;;  %632 = vmatprep.subr.bf16.mxu0 %v2762_v25  ;;  %v809_v12 = vld [vmem:[%s4011_s11 + $0x178] sm:$0xff]  ;;  %v824_v14 = vld [vmem:[%s4011_s11 + $0x1f0] sm:$0xff]  ;;  %v3429_v19 = vld [vmem:[#allocation4 + $0x28] sm:$0xff] }
  0x88   :  { %685 = vmatprep.subr.bf16.mxu1 %v2764_v26  ;;  %v776_v15 = vld [vmem:[%s4011_s11 + $0x70] sm:$0xff]  ;;  %v3431_v20 = vld [vmem:[#allocation4 + $0x38] sm:$0xff]  ;;  %v791_v21 = vld [vmem:[%s4011_s11 + $0xe8] sm:$0xff] }
  0x89   :  { %v808_v16 = vld [vmem:[%s4011_s11 + $0x170] sm:$0xff]  ;;  %v823_v22 = vld [vmem:[%s4011_s11 + $0x1e8] sm:$0xff]  ;;  %v790_v25 = vld [vmem:[%s4011_s11 + $0xe0] sm:$0xff] }
  0x8a   :  { %633 = vmatpush1.bf16.msra.mxu0 %v2766_v27  ;;  %v3427_v18 = vld [vmem:[#allocation4 + $0x30] sm:$0xff]  ;;  %v775_v23 = vld [vmem:[%s4011_s11 + $0x68] sm:$0xff]  ;;  %v822_v26 = vld [vmem:[%s4011_s11 + $0x1e0] sm:$0xff] }
  0x8b   :  { %686 = vmatpush1.bf16.msra.mxu1 %v2767_v28  ;;  %634 = vmatprep.subr.bf16.mxu0 %v2768_v29  ;;  %v807_v24 = vld [vmem:[%s4011_s11 + $0x168] sm:$0xff]  ;;  %v2502_v27 = vcombine.high %v3425_v17, %v3427_v18  ;;  %v2504_v28 = vcombine.high %v3429_v19, %v3431_v20  ;;  %v774_v29 = vld [vmem:[%s4011_s11 + $0x60] sm:$0xff]  ;;  %v785_v53 = vld [vmem:[%s4011_s11 + $0xb8] sm:$0xff] }
  0x8c   :  { %687 = vmatprep.subr.bf16.mxu1 %v2770_v30  ;;  %v806_v30 = vld [vmem:[%s4011_s11 + $0x160] sm:$0xff]  ;;  %v817_v54 = vld [vmem:[%s4011_s11 + $0x1b8] sm:$0xff] }
  0x8e   :  { %635 = vmatpush1.bf16.msra.mxu0 %v2772_v31  ;;  %v2501_v31 = vcombine.low %v3425_v17, %v3427_v18 }
  0x8f   :  { %688 = vmatpush1.bf16.msra.mxu1 %v2773_v32  ;;  %636 = vmatprep.subr.bf16.mxu0 %v2774_v33  ;;  %v2503_v32 = vcombine.low %v3429_v19, %v3431_v20  ;;  %v789_v33 = vld [vmem:[%s4011_s11 + $0xd8] sm:$0xff] }
  0x90   :  { %689 = vmatprep.subr.bf16.mxu1 %v2776_v34  ;;  %v821_v34 = vld [vmem:[%s4011_s11 + $0x1d8] sm:$0xff] }
  0x92   :  { %637 = vmatpush2.bf16.msra.mxu0 %v2778_v35  ;;  %v773_v35 = vld [vmem:[%s4011_s11 + $0x58] sm:$0xff] }
  0x93   :  { %690 = vmatpush2.bf16.msra.mxu1 %v2779_v36  ;;  %638 = vmatprep.subr.bf16.mxu0 %v2780_v37  ;;  %v805_v36 = vld [vmem:[%s4011_s11 + $0x158] sm:$0xff]  ;;  %v788_v37 = vld [vmem:[%s4011_s11 + $0xd0] sm:$0xff] }
  0x94   :  { %691 = vmatprep.subr.bf16.mxu1 %v2782_v38  ;;  %v820_v38 = vld [vmem:[%s4011_s11 + $0x1d0] sm:$0xff] }
  0x96   :  { %639 = vmatpush2.bf16.msra.mxu0 %v2784_v39  ;;  %v772_v39 = vld [vmem:[%s4011_s11 + $0x50] sm:$0xff] }
  0x97   :  { %692 = vmatpush2.bf16.msra.mxu1 %v2785_v40  ;;  %640 = vmatprep.subr.bf16.mxu0 %v2786_v41  ;;  %v804_v40 = vld [vmem:[%s4011_s11 + $0x150] sm:$0xff]  ;;  %v787_v41 = vld [vmem:[%s4011_s11 + $0xc8] sm:$0xff] }
  0x98   :  { %693 = vmatprep.subr.bf16.mxu1 %v2788_v42  ;;  %v819_v42 = vld [vmem:[%s4011_s11 + $0x1c8] sm:$0xff] }
  0x9a   :  { %641 = vmatpush2.bf16.msra.mxu0 %v2790_v43  ;;  %v771_v43 = vld [vmem:[%s4011_s11 + $0x48] sm:$0xff] }
  0x9b   :  { %694 = vmatpush2.bf16.msra.mxu1 %v2791_v44  ;;  %642 = vmatprep.subr.bf16.mxu0 %v2792_v45  ;;  %v803_v44 = vld [vmem:[%s4011_s11 + $0x148] sm:$0xff]  ;;  %v786_v45 = vld [vmem:[%s4011_s11 + $0xc0] sm:$0xff] }
  0x9c   :  { %695 = vmatprep.subr.bf16.mxu1 %v2794_v46  ;;  %v818_v46 = vld [vmem:[%s4011_s11 + $0x1c0] sm:$0xff] }
  0x9e   :  { %643 = vmatpush2.bf16.msra.mxu0 %v2796_v51  ;;  %v770_v51 = vld [vmem:[%s4011_s11 + $0x40] sm:$0xff] }
  0x9f   :  { %696 = vmatpush2.bf16.msra.mxu1 %v2797_v52  ;;  %644 = vmatprep.subr.bf16.mxu0 %v2798_v55  ;;  %v802_v52 = vld [vmem:[%s4011_s11 + $0x140] sm:$0xff]  ;;  %v769_v55 = vld [vmem:[%s4011_s11 + $0x38] sm:$0xff] }
  0xa0   :  { %697 = vmatprep.subr.bf16.mxu1 %v2800_v56  ;;  %v801_v56 = vld [vmem:[%s4011_s11 + $0x138] sm:$0xff] }
  0xa2   :  { %645 = vmatpush2.bf16.msra.mxu0 %v2802_v57  ;;  %v784_v57 = vld [vmem:[%s4011_s11 + $0xb0] sm:$0xff] }
  0xa3   :  { %698 = vmatpush2.bf16.msra.mxu1 %v2803_v58  ;;  %646 = vmatprep.subr.bf16.mxu0 %v2804_v59  ;;  %v816_v58 = vld [vmem:[%s4011_s11 + $0x1b0] sm:$0xff]  ;;  %v1008_v59 = vld [vmem:[%s4012_s3] sm:$0xff] }
  0xa4   :  { %699 = vmatprep.subr.bf16.mxu1 %v2806_v60  ;;  %v768_v60 = vld [vmem:[%s4011_s11 + $0x30] sm:$0xff]  ;;  %2830 = vrcp.f32 %v1008_v59  ;;  %v1508_v59 = vld [vmem:[#allocation13 + $0x120] sm:$0xff] }
  0xa6   :  { %647 = vmatpush2.bf16.msra.mxu0 %v2808_v61  ;;  %v800_v61 = vld [vmem:[%s4011_s11 + $0x130] sm:$0xff] }
  0xa7   :  { %700 = vmatpush2.bf16.msra.mxu1 %v2809_v62  ;;  %648 = vmatprep.subr.bf16.mxu0 %v2810_v63  ;;  %v1010_v62 = vld [vmem:[%s4012_s3 + $0x10] sm:$0xff]  ;;  %v783_v63 = vld [vmem:[%s4011_s11 + $0xa8] sm:$0xff] }
  0xa8   :  { %701 = vmatprep.subr.bf16.mxu1 %v2812_v0  ;;  %v815_v0 = vld [vmem:[%s4011_s11 + $0x1a8] sm:$0xff]  ;;  %2832 = vrcp.f32 %v1010_v62  ;;  %v1501_v62 = vld [vmem:[#allocation13 + $0xe8] sm:$0xff] }
  0xaa   :  { %649 = vmatpush2.bf16.msra.mxu0 %v2814_v1  ;;  %v767_v1 = vld [vmem:[%s4011_s11 + $0x28] sm:$0xff] }
  0xab   :  { %702 = vmatpush2.bf16.msra.mxu1 %v2815_v2  ;;  %650 = vmatprep.subr.bf16.mxu0 %v2816_v3  ;;  %v799_v2 = vld [vmem:[%s4011_s11 + $0x128] sm:$0xff]  ;;  %v782_v3 = vld [vmem:[%s4011_s11 + $0xa0] sm:$0xff] }
  0xac   :  { %703 = vmatprep.subr.bf16.mxu1 %v2818_v4  ;;  %v814_v4 = vld [vmem:[%s4011_s11 + $0x1a0] sm:$0xff] }
  0xae   :  { %651 = vmatpush2.bf16.msra.mxu0 %v2820_v5  ;;  %v1009_v5 = vld [vmem:[%s4012_s3 + $0x8] sm:$0xff] }
  0xaf   :  { %704 = vmatpush2.bf16.msra.mxu1 %v2821_v6  ;;  %2585 = vmatprep.subr.mxu0 %v793_v7  ;;  %v766_v6 = vld [vmem:[%s4011_s11 + $0x20] sm:$0xff]  ;;  %2834 = vrcp.f32 %v1009_v5  ;;  %v1488_v5 = vld [vmem:[#allocation13 + $0x80] sm:$0xff] }
  0xb0   :  { %2629 = vmatprep.subr.mxu1 %v825_v8  ;;  %v798_v7 = vld [vmem:[%s4011_s11 + $0x120] sm:$0xff]  ;;  %v1011_v8 = vld [vmem:[%s4012_s3 + $0x18] sm:$0xff] }
  0xb1   :  { %653 = vmatmul.mubr.bf16.vlgmr.msra.gmra.mxu0 %v2497_v9  ;;  %v781_v9 = vld [vmem:[%s4011_s11 + $0x98] sm:$0xff]  ;;  %2836 = vrcp.f32 %v1011_v8  ;;  %v1481_v8 = vld [vmem:[#allocation13 + $0x48] sm:$0xff] }
  0xb2   :  { %706 = vmatmul.mubr.bf16.vlgmr.msra.gmra.mxu1 %v2499_v10  ;;  %2586 = vmatpush3.msra.mxu0 %v777_v11  ;;  %v813_v10 = vld [vmem:[%s4011_s11 + $0x198] sm:$0xff] }
  0xb3   :  { %2630 = vmatpush3.msra.mxu1 %v809_v12  ;;  %2587 = vmatprep.subr.mxu0 %v792_v13  ;;  %v765_v11 = vld [vmem:[%s4011_s11 + $0x18] sm:$0xff]  ;;  %v780_v13 = vld [vmem:[%s4011_s11 + $0x90] sm:$0xff] }
  0xb4   :  { %2631 = vmatprep.subr.mxu1 %v824_v14  ;;  %2588 = vmatpush3.msra.mxu0 %v776_v15  ;;  %v797_v12 = vld [vmem:[%s4011_s11 + $0x118] sm:$0xff]  ;;  %v812_v14 = vld [vmem:[%s4011_s11 + $0x190] sm:$0xff] }
  0xb5   :  { %2632 = vmatpush3.msra.mxu1 %v808_v16  ;;  %2589 = vmatprep.subr.mxu0 %v791_v21  ;;  %v764_v15 = vld [vmem:[%s4011_s11 + $0x10] sm:$0xff]  ;;  %v779_v21 = vld [vmem:[%s4011_s11 + $0x88] sm:$0xff] }
  0xb6   :  { %2633 = vmatprep.subr.mxu1 %v823_v22  ;;  %2590 = vmatpush3.msra.mxu0 %v775_v23  ;;  %v796_v16 = vld [vmem:[%s4011_s11 + $0x110] sm:$0xff]  ;;  %v811_v22 = vld [vmem:[%s4011_s11 + $0x188] sm:$0xff] }
  0xb7   :  { %2634 = vmatpush3.msra.mxu1 %v807_v24  ;;  %2591 = vmatprep.subr.mxu0 %v790_v25  ;;  %v763_v23 = vld [vmem:[%s4011_s11 + $0x8] sm:$0xff]  ;;  %v778_v25 = vld [vmem:[%s4011_s11 + $0x80] sm:$0xff] }
  0xb8   :  { %2635 = vmatprep.subr.mxu1 %v822_v26  ;;  %662 = vmatprep.mubr.bf16.mxu0 %v2502_v27  ;;  %v795_v24 = vld [vmem:[%s4011_s11 + $0x108] sm:$0xff]  ;;  %v810_v26 = vld [vmem:[%s4011_s11 + $0x180] sm:$0xff]  ;;  %v747_v27 = vunpack.c.h.bf16 %v3331_v47 }
  0xb9   :  { %715 = vmatprep.mubr.bf16.mxu1 %v2504_v28  ;;  %2592 = vmatpush3.msra.mxu0 %v774_v29  ;;  %v762_v28 = vld [vmem:[%s4011_s11] sm:$0xff]  ;;  %v749_v29 = vunpack.c.h.bf16 %v3335_v49 }
  0xba   :  { %2636 = vmatpush3.msra.mxu1 %v806_v30  ;;  %663 = vmatmul.mubr.bf16.gmra.mxu0 %v2501_v31  ;;  %v746_v30 = vunpack.c.l.bf16 %v3331_v47  ;;  %v748_v31 = vunpack.c.l.bf16 %v3335_v49  ;;  %v750_v47 = vunpack.c.l.bf16 %v3333_v48  ;;  %v752_v49 = vunpack.c.l.bf16 %v3337_v50 }
  0xbb   :  { %716 = vmatmul.mubr.bf16.gmra.mxu1 %v2503_v32  ;;  %2593 = vmatprep.subr.mxu0 %v789_v33  ;;  %v794_v32 = vld [vmem:[%s4011_s11 + $0x100] sm:$0xff]  ;;  %v751_v33 = vunpack.c.h.bf16 %v3333_v48  ;;  %v759_v48 = vunpack.c.h.bf16 %v3427_v18 }
  0xbc   :  { %2637 = vmatprep.subr.mxu1 %v821_v34  ;;  %2594 = vmatpush3.msra.mxu0 %v773_v35  ;;  %v753_v34 = vunpack.c.h.bf16 %v3337_v50  ;;  %v2831_v35 = vpop.eup %2830  ;;  %v761_v50 = vunpack.c.h.bf16 %v3431_v20 }
  0xbd   :  { %2638 = vmatpush3.msra.mxu1 %v805_v36  ;;  %2595 = vmatprep.subr.mxu0 %v788_v37  ;;  %v2833_v36 = vpop.eup %2832  ;;  %v755_v37 = vunpack.c.h.bf16 %v3425_v17 }
  0xbe   :  { %2639 = vmatprep.subr.mxu1 %v820_v38  ;;  %2596 = vmatpush3.msra.mxu0 %v772_v39  ;;  %v757_v38 = vunpack.c.h.bf16 %v3429_v19  ;;  %v2835_v39 = vpop.eup %2834 }
  0xbf   :  { %2640 = vmatpush3.msra.mxu1 %v804_v40  ;;  %2597 = vmatprep.subr.mxu0 %v787_v41  ;;  %v2837_v40 = vpop.eup %2836  ;;  %v754_v41 = vunpack.c.l.bf16 %v3425_v17  ;;  %v1533_v17 = vld [vmem:[#allocation13 + $0x1e8] sm:$0xff] }
  0xc0   :  { %2641 = vmatprep.subr.mxu1 %v819_v42  ;;  %2598 = vmatpush3.msra.mxu0 %v771_v43  ;;  %v756_v42 = vunpack.c.l.bf16 %v3429_v19  ;;  %v758_v43 = vunpack.c.l.bf16 %v3427_v18  ;;  %v1532_v19 = vld [vmem:[#allocation13 + $0x1e0] sm:$0xff]  ;;  %v1521_v18 = vld [vmem:[#allocation13 + $0x188] sm:$0xff] }
  0xc1   :  { %2642 = vmatpush3.msra.mxu1 %v803_v44  ;;  %2599 = vmatprep.subr.mxu0 %v786_v45  ;;  %v760_v44 = vunpack.c.l.bf16 %v3431_v20  ;;  %v1529_v45 = vld [vmem:[#allocation13 + $0x1c8] sm:$0xff]  ;;  %v1520_v20 = vld [vmem:[#allocation13 + $0x180] sm:$0xff] }
  0xc2   :  { %2643 = vmatprep.subr.mxu1 %v818_v46  ;;  %2600 = vmatpush3.msra.mxu0 %v770_v51  ;;  %v1528_v46 = vld [vmem:[#allocation13 + $0x1c0] sm:$0xff]  ;;  %v1525_v51 = vld [vmem:[#allocation13 + $0x1a8] sm:$0xff] }
  0xc3   :  { %2644 = vmatpush3.msra.mxu1 %v802_v52  ;;  %2601 = vmatprep.subr.mxu0 %v785_v53  ;;  %v1524_v52 = vld [vmem:[#allocation13 + $0x1a0] sm:$0xff]  ;;  %v3057_v53 = vmov 0.0  }
  0xc4   :  { %2645 = vmatprep.subr.mxu1 %v817_v54  ;;  %2602 = vmatpush3.msra.mxu0 %v769_v55  ;;  %176 = vst.msk [vmem:[#allocation3] sm:$0xff] %vm175_vm0, %v3057_v53  ;;  %177 = vst.msk [vmem:[#allocation3 + $0x8] sm:$0xff] %vm175_vm0, %v3057_v53  ;;  %v1517_v54 = vld [vmem:[#allocation13 + $0x168] sm:$0xff]  ;;  %v1516_v55 = vld [vmem:[#allocation13 + $0x160] sm:$0xff] }
  0xc5   :  { %2646 = vmatpush3.msra.mxu1 %v801_v56  ;;  %2603 = vmatprep.subr.mxu0 %v784_v57  ;;  %178 = vst.msk [vmem:[#allocation3 + $0x10] sm:$0xff] %vm175_vm0, %v3057_v53  ;;  %179 = vst.msk [vmem:[#allocation3 + $0x18] sm:$0xff] %vm175_vm0, %v3057_v53  ;;  %v1513_v56 = vld [vmem:[#allocation13 + $0x148] sm:$0xff]  ;;  %v1512_v57 = vld [vmem:[#allocation13 + $0x140] sm:$0xff] }
  0xc6   :  { %2647 = vmatprep.subr.mxu1 %v816_v58  ;;  %2604 = vmatpush3.msra.mxu0 %v768_v60  ;;  %v1509_v58 = vld [vmem:[#allocation13 + $0x128] sm:$0xff] }
  0xc7   :  { %2648 = vmatpush3.msra.mxu1 %v800_v61  ;;  %2605 = vmatprep.subr.mxu0 %v783_v63  ;;  %v1505_v60 = vld [vmem:[#allocation13 + $0x108] sm:$0xff]  ;;  %v1504_v61 = vld [vmem:[#allocation13 + $0x100] sm:$0xff] }
  0xc8   :  { %2649 = vmatprep.subr.mxu1 %v815_v0  ;;  %2606 = vmatpush3.msra.mxu0 %v767_v1  ;;  %v1500_v63 = vld [vmem:[#allocation13 + $0xe0] sm:$0xff]  ;;  %v1497_v0 = vld [vmem:[#allocation13 + $0xc8] sm:$0xff] }
  0xc9   :  { %2650 = vmatpush3.msra.mxu1 %v799_v2  ;;  %2607 = vmatprep.subr.mxu0 %v782_v3  ;;  %v1496_v1 = vld [vmem:[#allocation13 + $0xc0] sm:$0xff]  ;;  %v1493_v2 = vld [vmem:[#allocation13 + $0xa8] sm:$0xff] }
  0xca   :  { %2651 = vmatprep.subr.mxu1 %v814_v4  ;;  %2608 = vmatpush3.msra.mxu0 %v766_v6  ;;  %v1492_v3 = vld [vmem:[#allocation13 + $0xa0] sm:$0xff]  ;;  %v1489_v4 = vld [vmem:[#allocation13 + $0x88] sm:$0xff] }
  0xcb   :  { %2652 = vmatpush3.msra.mxu1 %v798_v7  ;;  %2609 = vmatprep.subr.mxu0 %v781_v9  ;;  %v1485_v6 = vld [vmem:[#allocation13 + $0x68] sm:$0xff]  ;;  %v1484_v7 = vld [vmem:[#allocation13 + $0x60] sm:$0xff] }
  0xcc   :  { %2653 = vmatprep.subr.mxu1 %v813_v10  ;;  %2610 = vmatpush3.msra.mxu0 %v765_v11  ;;  %v1480_v9 = vld [vmem:[#allocation13 + $0x40] sm:$0xff]  ;;  %v1477_v10 = vld [vmem:[#allocation13 + $0x28] sm:$0xff] }
  0xcd   :  { %2654 = vmatpush3.msra.mxu1 %v797_v12  ;;  %2611 = vmatprep.subr.mxu0 %v780_v13  ;;  %v1476_v11 = vld [vmem:[#allocation13 + $0x20] sm:$0xff]  ;;  %v1473_v12 = vld [vmem:[#allocation13 + $0x8] sm:$0xff] }
  0xce   :  { %2655 = vmatprep.subr.mxu1 %v812_v14  ;;  %2612 = vmatpush3.msra.mxu0 %v764_v15  ;;  %v1472_v13 = vld [vmem:[#allocation13] sm:$0xff]  ;;  %v1597_v14 = vld [vmem:[#allocation13 + $0x3e8] sm:$0xff] }
  0xcf   :  { %2656 = vmatpush3.msra.mxu1 %v796_v16  ;;  %2613 = vmatprep.subr.mxu0 %v779_v21  ;;  %v1596_v15 = vld [vmem:[#allocation13 + $0x3e0] sm:$0xff]  ;;  %v1593_v16 = vld [vmem:[#allocation13 + $0x3c8] sm:$0xff] }
  0xd0   :  { %2657 = vmatprep.subr.mxu1 %v811_v22  ;;  %2614 = vmatpush3.msra.mxu0 %v763_v23  ;;  %v1592_v21 = vld [vmem:[#allocation13 + $0x3c0] sm:$0xff]  ;;  %v1589_v22 = vld [vmem:[#allocation13 + $0x3a8] sm:$0xff] }
  0xd1   :  { %2658 = vmatpush3.msra.mxu1 %v795_v24  ;;  %2615 = vmatprep.subr.mxu0 %v778_v25  ;;  %v1588_v23 = vld [vmem:[#allocation13 + $0x3a0] sm:$0xff]  ;;  %v1585_v24 = vld [vmem:[#allocation13 + $0x388] sm:$0xff] }
  0xd2   :  { %2659 = vmatprep.subr.mxu1 %v810_v26  ;;  %2616 = vmatpush3.msra.mxu0 %v762_v28  ;;  %v1584_v25 = vld [vmem:[#allocation13 + $0x380] sm:$0xff]  ;;  %v1581_v26 = vld [vmem:[#allocation13 + $0x368] sm:$0xff] }
  0xd3   :  { %890 = vmatprep.mubr.f32.mxu0 %v747_v27  ;;  %2660 = vmatpush3.msra.mxu1 %v794_v32  ;;  %v1580_v27 = vld [vmem:[#allocation13 + $0x360] sm:$0xff]  ;;  %v1577_v28 = vld [vmem:[#allocation13 + $0x348] sm:$0xff] }
  0xd4   :  { %975 = vmatprep.mubr.f32.mxu1 %v749_v29  ;;  %891 = vmatmul.mubr.f32.vlgmr.msra.gmra.mxu0 %v746_v30  ;;  %v1576_v29 = vld [vmem:[#allocation13 + $0x340] sm:$0xff]  ;;  %v1573_v30 = vld [vmem:[#allocation13 + $0x328] sm:$0xff] }
  0xd5   :  { %976 = vmatmul.mubr.f32.vlgmr.msra.gmra.mxu1 %v748_v31  ;;  %895 = vmatprep.mubr.f32.mxu0 %v751_v33  ;;  %v1572_v31 = vld [vmem:[#allocation13 + $0x320] sm:$0xff]  ;;  %v1569_v32 = vld [vmem:[#allocation13 + $0x308] sm:$0xff] }
  0xd6   :  { %980 = vmatprep.mubr.f32.mxu1 %v753_v34  ;;  %1026 = vperm.xlu0 %2724, %v2831_v35   ;;  %v1568_v33 = vld [vmem:[#allocation13 + $0x300] sm:$0xff]  ;;  %v1565_v34 = vld [vmem:[#allocation13 + $0x2e8] sm:$0xff] }
  0xd7   :  { %1036 = vperm.xlu1 %2725, %v2833_v36   ;;  %1600 = vmatprep.subr.mxu0 %v1533_v17  ;;  %v1564_v35 = vld [vmem:[#allocation13 + $0x2e0] sm:$0xff]  ;;  %v1561_v36 = vld [vmem:[#allocation13 + $0x2c8] sm:$0xff] }
  0xd8   :  { %896 = vmatmul.mubr.f32.gmra.mxu0 %v750_v47  ;;  %v1560_v47 = vld [vmem:[#allocation13 + $0x2c0] sm:$0xff] }
  0xd9   :  { %981 = vmatmul.mubr.f32.gmra.mxu1 %v752_v49  ;;  %900 = vmatprep.mubr.f32.mxu0 %v755_v37  ;;  %v1557_v49 = vld [vmem:[#allocation13 + $0x2a8] sm:$0xff]  ;;  %v1556_v37 = vld [vmem:[#allocation13 + $0x2a0] sm:$0xff] }
  0xda   :  { %985 = vmatprep.mubr.f32.mxu1 %v757_v38  ;;  %1031 = vperm.xlu0 %2724, %v2835_v39   ;;  %v1553_v38 = vld [vmem:[#allocation13 + $0x288] sm:$0xff]  ;;  %v1552_v39 = vld [vmem:[#allocation13 + $0x280] sm:$0xff] }
  0xdb   :  { %1041 = vperm.xlu1 %2725, %v2837_v40   ;;  %1601 = vmatpush1.msra.mxu0 %v1532_v19  ;;  %v1549_v40 = vld [vmem:[#allocation13 + $0x268] sm:$0xff]  ;;  %v1536_v17 = vld [vmem:[#allocation13 + $0x200] sm:$0xff]  ;;  %v1131_v19 = vld [vmem:[%s3988_s6] sm:$0xf] }
  0xdc   :  { %901 = vmatmul.mubr.f32.gmra.mxu0 %v754_v41  ;;  %1602 = vmatprep.subr.mxu0 %v1529_v45  ;;  %v1548_v41 = vld [vmem:[#allocation13 + $0x260] sm:$0xff] }
  0xdd   :  { %986 = vmatmul.mubr.f32.gmra.mxu1 %v756_v42  ;;  %905 = vmatprep.mubr.f32.mxu0 %v759_v48  ;;  %v1545_v42 = vld [vmem:[#allocation13 + $0x248] sm:$0xff]  ;;  %v1544_v48 = vld [vmem:[#allocation13 + $0x240] sm:$0xff] }
  0xde   :  { %990 = vmatprep.mubr.f32.mxu1 %v761_v50  ;;  %1603 = vmatpush1.msra.mxu0 %v1528_v46  ;;  %v1541_v50 = vld [vmem:[#allocation13 + $0x228] sm:$0xff] }
  0xdf   :  { %1604 = vmatprep.subr.mxu0 %v1525_v51  ;;  %2686 = vmatprep.subr.msk.mxu1 %vm1151_vm1, %v1131_v19 }
  0xe0   :  { %906 = vmatmul.mubr.f32.gmra.mxu0 %v758_v43  ;;  %v1540_v43 = vld [vmem:[#allocation13 + $0x220] sm:$0xff]  ;;  %2687 = vmatpush3.msk.msra.mxu1 %vm1151_vm1, %v1131_v19 }
  0xe1   :  { %991 = vmatmul.mubr.f32.gmra.mxu1 %v760_v44  ;;  %1605 = vmatpush1.msra.mxu0 %v1524_v52  ;;  %v1537_v44 = vld [vmem:[#allocation13 + $0x208] sm:$0xff] }
  0xe2   :  { %1606 = vmatprep.subr.mxu0 %v1521_v18 }
  0xe3   :  { %1607 = vmatpush1.msra.mxu0 %v1520_v20 }
  0xe4   :  { %1608 = vmatprep.subr.mxu0 %v1517_v54 }
  0xe5   :  { %1609 = vmatpush1.msra.mxu0 %v1516_v55 }
  0xe6   :  { %1610 = vmatprep.subr.mxu0 %v1513_v56 }
  0xe7   :  { %1611 = vmatpush1.msra.mxu0 %v1512_v57 }
  0xe8   :  { %1612 = vmatprep.subr.mxu0 %v1509_v58 }
  0xe9   :  { %1613 = vmatpush1.msra.mxu0 %v1508_v59 }
  0xea   :  { %1614 = vmatprep.subr.mxu0 %v1505_v60 }
  0xeb   :  { %1615 = vmatpush1.msra.mxu0 %v1504_v61 }
  0xec   :  { %1616 = vmatprep.subr.mxu0 %v1501_v62 }
  0xed   :  { %1617 = vmatpush1.msra.mxu0 %v1500_v63 }
  0xee   :  { %1618 = vmatprep.subr.mxu0 %v1497_v0 }
  0xef   :  { %1619 = vmatpush1.msra.mxu0 %v1496_v1 }
  0xf0   :  { %1620 = vmatprep.subr.mxu0 %v1493_v2 }
  0xf1   :  { %1621 = vmatpush1.msra.mxu0 %v1492_v3 }
  0xf2   :  { %1622 = vmatprep.subr.mxu0 %v1489_v4 }
  0xf3   :  { %1623 = vmatpush1.msra.mxu0 %v1488_v5 }
  0xf4   :  { %1624 = vmatprep.subr.mxu0 %v1485_v6 }
  0xf5   :  { %1625 = vmatpush1.msra.mxu0 %v1484_v7 }
  0xf6   :  { %1626 = vmatprep.subr.mxu0 %v1481_v8 }
  0xf7   :  { %1627 = vmatpush1.msra.mxu0 %v1480_v9 }
  0xf8   :  { %1628 = vmatprep.subr.mxu0 %v1477_v10 }
  0xf9   :  { %1629 = vmatpush1.msra.mxu0 %v1476_v11 }
  0xfa   :  { %1630 = vmatprep.subr.mxu0 %v1473_v12 }
  0xfb   :  { %1631 = vmatpush1.msra.mxu0 %v1472_v13 }
  0xfc   :  { %1632 = vmatprep.subr.mxu0 %v1597_v14 }
  0xfd   :  { %1633 = vmatpush2.msra.mxu0 %v1596_v15 }
  0xfe   :  { %1634 = vmatprep.subr.mxu0 %v1593_v16 }
  0xff   :  { %1635 = vmatpush2.msra.mxu0 %v1592_v21 }
 0x100   :  { %1636 = vmatprep.subr.mxu0 %v1589_v22 }
 0x101   :  { %1637 = vmatpush2.msra.mxu0 %v1588_v23 }
 0x102   :  { %1638 = vmatprep.subr.mxu0 %v1585_v24 }
 0x103   :  { %1639 = vmatpush2.msra.mxu0 %v1584_v25 }
 0x104   :  { %1640 = vmatprep.subr.mxu0 %v1581_v26 }
 0x105   :  { %1641 = vmatpush2.msra.mxu0 %v1580_v27 }
 0x106   :  { %1642 = vmatprep.subr.mxu0 %v1577_v28 }
 0x107   :  { %1643 = vmatpush2.msra.mxu0 %v1576_v29 }
 0x108   :  { %1644 = vmatprep.subr.mxu0 %v1573_v30 }
 0x109   :  { %1645 = vmatpush2.msra.mxu0 %v1572_v31 }
 0x10a   :  { %1646 = vmatprep.subr.mxu0 %v1569_v32 }
 0x10b   :  { %1647 = vmatpush2.msra.mxu0 %v1568_v33 }
 0x10c   :  { %1648 = vmatprep.subr.mxu0 %v1565_v34 }
 0x10d   :  { %1649 = vmatpush2.msra.mxu0 %v1564_v35 }
 0x10e   :  { %1650 = vmatprep.subr.mxu0 %v1561_v36 }
 0x10f   :  { %1651 = vmatpush2.msra.mxu0 %v1560_v47 }
 0x110   :  { %1652 = vmatprep.subr.mxu0 %v1557_v49 }
 0x111   :  { %1653 = vmatpush2.msra.mxu0 %v1556_v37 }
 0x112   :  { %1654 = vmatprep.subr.mxu0 %v1553_v38 }
 0x113   :  { %1655 = vmatpush2.msra.mxu0 %v1552_v39 }
 0x114   :  { %1656 = vmatprep.subr.mxu0 %v1549_v40 }
 0x115   :  { %1657 = vmatpush2.msra.mxu0 %v1548_v41 }
 0x116   :  { %1658 = vmatprep.subr.mxu0 %v1545_v42 }
 0x117   :  { %1659 = vmatpush2.msra.mxu0 %v1544_v48 }
 0x118   :  { %1660 = vmatprep.subr.mxu0 %v1541_v50 }
 0x119   :  { %1661 = vmatpush2.msra.mxu0 %v1540_v43 }
 0x11a   :  { %1662 = vmatprep.subr.mxu0 %v1537_v44 }
 0x11b   :  { %1663 = vmatpush2.msra.mxu0 %v1536_v17 }
 0x151   :  { %v3648_v51 = vpop.permute.xlu0 %1026 }
 0x152   :  { %v3650_v55 = vpop.permute.xlu1 %1036 }
 0x155   :  { %v3652_v59 = vpop.permute.xlu0 %1031 }
 0x156   :  { %v3658_v9 = vpop.permute.xlu1 %1041 }
 0x171   :  { %v654_v45 = vpop.f32.mrf.mxu0 }
 0x172   :  { %v707_v46 = vpop.f32.mrf.mxu1 }
 0x173   :  { %v656_v52 = vpop.f32.mrf.mxu0  ;;  %v708_v60 = vadd.f32 %v707_v46, %v654_v45 }
 0x174   :  { %v709_v18 = vpop.f32.mrf.mxu1 }
 0x175   :  { %v658_v20 = vpop.f32.mrf.mxu0  ;;  %v710_v0 = vadd.f32 %v709_v18, %v656_v52  ;;  %v1056_v5 = vmul.f32 %v3648_v51, %v708_v60 }
 0x176   :  { %v711_v54 = vpop.f32.mrf.mxu1 }
 0x177   :  { %v712_v56 = vadd.f32 %v711_v54, %v658_v20  ;;  %v660_v57 = vpop.f32.mrf.mxu0  ;;  %v1057_v12 = vmul.f32 %v3648_v51, %v710_v0 }
 0x178   :  { %v713_v58 = vpop.f32.mrf.mxu1 }
 0x179   :  { %v714_v61 = vadd.f32 %v713_v58, %v660_v57  ;;  %v1058_v1 = vmul.f32 %v3652_v59, %v712_v56 }
 0x17a   :  { %v664_v62 = vpop.f32.mrf.mxu0 }
 0x17b   :  { %v717_v63 = vpop.f32.mrf.mxu1  ;;  %v1059_v6 = vmul.f32 %v3652_v59, %v714_v61  ;;  %v1355_v13 = vadd.f32 %v1058_v1, %v1056_v5 }
 0x17c   :  { %v718_v2 = vadd.f32 %v717_v63, %v664_v62  ;;  %v666_v3 = vpop.f32.mrf.mxu0  ;;  %v742_v62 = vld [vmem:[#allocation3] sm:$0xff] }
 0x17d   :  { %v719_v4 = vpop.f32.mrf.mxu1  ;;  %v1364_v22 = vadd.f32 %v1059_v6, %v1057_v12 }
 0x17e   :  { %v1060_v7 = vmul.f32 %v3650_v55, %v718_v2  ;;  %v720_v8 = vadd.f32 %v719_v4, %v666_v3  ;;  %v668_v10 = vpop.f32.mrf.mxu0 }
 0x17f   :  { %v721_v11 = vpop.f32.mrf.mxu1 }
 0x180   :  { %v1061_v14 = vmul.f32 %v3650_v55, %v720_v8  ;;  %v722_v15 = vadd.f32 %v721_v11, %v668_v10  ;;  %v670_v16 = vpop.f32.mrf.mxu0  ;;  %v1356_v23 = vadd.f32 %v1355_v13, %v1060_v7 }
 0x181   :  { %v723_v21 = vpop.f32.mrf.mxu1 }
 0x182   :  { %v1062_v24 = vmul.f32 %v3658_v9, %v722_v15  ;;  %v724_v25 = vadd.f32 %v723_v21, %v670_v16  ;;  %v1365_v26 = vadd.f32 %v1364_v22, %v1061_v14  ;;  %v743_v16 = vld [vmem:[#allocation3 + $0x8] sm:$0xff] }
 0x184   :  { %v1357_v27 = vadd.f32 %v1356_v23, %v1062_v24  ;;  %v1063_v28 = vmul.f32 %v3658_v9, %v724_v25 }
 0x186   :  { %v1358_v29 = vrot.slane %v1357_v27, 4  ;;  %v1366_v30 = vadd.f32 %v1365_v26, %v1063_v28 }
 0x188   :  { %v1359_v31 = vadd.f32 %v1358_v29, %v1357_v27  ;;  %v1367_v32 = vrot.slane %v1366_v30, 4 }
 0x18a   :  { %v1360_v33 = vrot.slane %v1359_v31, 2  ;;  %v1368_v34 = vadd.f32 %v1367_v32, %v1366_v30 }
 0x18c   :  { %v1361_v35 = vadd.f32 %v1360_v33, %v1359_v31  ;;  %v1369_v36 = vrot.slane %v1368_v34, 2  ;;  %v744_v33 = vld [vmem:[#allocation3 + $0x10] sm:$0xff] }
 0x18e   :  { %v1362_v47 = vrot.slane %v1361_v35, 1  ;;  %v1370_v49 = vadd.f32 %v1369_v36, %v1368_v34 }
 0x190   :  { %v1363_v37 = vadd.f32 %v1362_v47, %v1361_v35  ;;  %v1371_v38 = vrot.slane %v1370_v49, 1 }
 0x192   :  { %v1373_v39 = vmul.f32 0.03125, %v1363_v37  ;;  %v1372_v40 = vadd.f32 %v1371_v38, %v1370_v49 }
 0x194   :  { %v3664_v41 = vsub.f32 %v1056_v5, %v1373_v39  ;;  %v3666_v42 = vsub.f32 %v1058_v1, %v1373_v39  ;;  %v3668_v48 = vsub.f32 %v1060_v7, %v1373_v39  ;;  %v1374_v50 = vmul.f32 0.03125, %v1372_v40  ;;  %v2617_v43 = vpop.f32.mrf.mxu0 }
 0x195   :  { %v2661_v44 = vpop.f32.mrf.mxu1  ;;  %v3670_v17 = vsub.f32 %v1062_v24, %v1373_v39 }
 0x196   :  { %v1383_v19 = vmul.f32 %v3664_v41, %v3664_v41  ;;  %v1385_v45 = vmul.f32 %v3666_v42, %v3666_v42  ;;  %v2618_v46 = vpop.f32.mrf.mxu0  ;;  %v3676_v18 = vsub.f32 %v1057_v12, %v1374_v50  ;;  %v3678_v20 = vsub.f32 %v1059_v6, %v1374_v50 }
 0x197   :  { %v2662_v52 = vpop.f32.mrf.mxu1  ;;  %v3680_v54 = vsub.f32 %v1061_v14, %v1374_v50  ;;  %v1387_v56 = vmul.f32 %v3668_v48, %v3668_v48  ;;  %v2619_v58 = vadd.f32 %v2618_v46, %v2617_v43  ;;  %v3684_v61 = vsub.f32 %v1063_v28, %v1374_v50 }
 0x198   :  { %v1391_v57 = vadd.f32 %v1385_v45, %v1383_v19  ;;  %v2663_v60 = vadd.f32 %v2662_v52, %v2661_v44  ;;  %v2620_v63 = vpop.f32.mrf.mxu0  ;;  %v1384_v1 = vmul.f32 %v3676_v18, %v3676_v18  ;;  %v1386_v2 = vmul.f32 %v3678_v20, %v3678_v20  ;;  %v745_v19 = vld [vmem:[#allocation3 + $0x18] sm:$0xff] }
 0x199   :  { %v2664_v0 = vpop.f32.mrf.mxu1  ;;  %v1389_v3 = vmul.f32 %v3670_v17, %v3670_v17  ;;  %v1388_v8 = vmul.f32 %v3680_v54, %v3680_v54  ;;  %v1390_v15 = vmul.f32 %v3684_v61, %v3684_v61 }
 0x19a   :  { %v1392_v4 = vadd.f32 %v1391_v57, %v1387_v56  ;;  %v978_v5 = vadd.f32 %v2663_v60, %v2619_v58  ;;  %v2621_v6 = vpop.f32.mrf.mxu0  ;;  %v1400_v10 = vadd.f32 %v1386_v2, %v1384_v1 }
 0x19b   :  { %v2665_v7 = vpop.f32.mrf.mxu1  ;;  %v2622_v13 = vadd.f32 %v2621_v6, %v2620_v63 }
 0x19c   :  { %v1393_v11 = vadd.f32 %v1392_v4, %v1389_v3  ;;  %v996_v12 = vadd.f32 %v978_v5, %v742_v62  ;;  %v2666_v14 = vadd.f32 %v2665_v7, %v2664_v0  ;;  %v2623_v21 = vpop.f32.mrf.mxu0  ;;  %v1401_v23 = vadd.f32 %v1400_v10, %v1388_v8 }
 0x19d   :  { %v2667_v22 = vpop.f32.mrf.mxu1 }
 0x19e   :  { %v1394_v24 = vrot.slane %v1393_v11, 4  ;;  %1001 = vst.msk [vmem:[#allocation3] sm:$0xff] %vm175_vm0, %v996_v12  ;;  %v983_v25 = vadd.f32 %v2666_v14, %v2622_v13  ;;  %v2624_v26 = vpop.f32.mrf.mxu0  ;;  %v1402_v28 = vadd.f32 %v1401_v23, %v1390_v15  ;;  %v1112_v15 = vlaneseq }
 0x19f   :  { %v2668_v27 = vpop.f32.mrf.mxu1  ;;  %v2625_v31 = vadd.f32 %v2624_v26, %v2623_v21 }
 0x1a0   :  { %v1395_v29 = vadd.f32 %v1394_v24, %v1393_v11  ;;  %v997_v30 = vadd.f32 %v983_v25, %v743_v16  ;;  %v2669_v32 = vadd.f32 %v2668_v27, %v2667_v22  ;;  %v2626_v34 = vpop.f32.mrf.mxu0  ;;  %v1403_v36 = vrot.slane %v1402_v28, 4 }
 0x1a1   :  { %v2670_v35 = vpop.f32.mrf.mxu1  ;;  %v3058_v16 = vmov 1966171168   ;;  %v3724_v24 = vshrl.u32 %v1112_v15, 7 }
 0x1a2   :  { %v1396_v47 = vrot.slane %v1395_v29, 2  ;;  %1002 = vst.msk [vmem:[#allocation3 + $0x8] sm:$0xff] %vm175_vm0, %v997_v30  ;;  %v988_v49 = vadd.f32 %v2669_v32, %v2625_v31  ;;  %v2627_v37 = vpop.f32.mrf.mxu0  ;;  %v1404_v39 = vadd.f32 %v1403_v36, %v1402_v28  ;;  %v1419_v21 = vunpack.c.l.s4 %v3058_v16 }
 0x1a3   :  { %v2671_v38 = vpop.f32.mrf.mxu1  ;;  %v2628_v43 = vadd.f32 %v2627_v37, %v2626_v34  ;;  %v3734_v36 = vsub.s32 0, %v3724_v24  ;;  %v3738_v37 = vsub.s32 1, %v3724_v24 }
 0x1a4   :  { %v1397_v40 = vadd.f32 %v1396_v47, %v1395_v29  ;;  %v998_v50 = vadd.f32 %v988_v49, %v744_v33  ;;  %v2672_v44 = vadd.f32 %v2671_v38, %v2670_v35  ;;  %v1405_v45 = vrot.slane %v1404_v39, 2  ;;  %v1353_v35 = vld [vmem:[%s3992_s10] sm:$0x3]  ;;  %v1354_v47 = vld [vmem:[#allocation12] sm:$0x3] }
 0x1a5   :  { %v1020_v46 = vld [vmem:[#allocation3] sm:$0xff]  ;;  %v1420_v25 = vunpack.c.0.s8 %v1419_v21 }
 0x1a6   :  { %v1398_v52 = vrot.slane %v1397_v40, 1  ;;  %1003 = vst.msk [vmem:[#allocation3 + $0x10] sm:$0xff] %vm175_vm0, %v998_v50  ;;  %v993_v56 = vadd.f32 %v2672_v44, %v2628_v43  ;;  %v1044_v57 = vmul.f32 %v3648_v51, %v1020_v46  ;;  %v1406_v58 = vadd.f32 %v1405_v45, %v1404_v39 }
 0x1a7   :  { %v1457_v43 = vrot.slane %v1354_v47, %v3734_v36  ;;  %v1461_v45 = vrot.slane %v1354_v47, %v3738_v37 }
 0x1a8   :  { %v1399_v60 = vadd.f32 %v1398_v52, %v1397_v40  ;;  %v999_v62 = vadd.f32 %v993_v56, %v745_v19  ;;  %1065 = vst.msk [vmem:[%s4001_s19] sm:$0xff] %vm1064_vm2, %v1044_v57  ;;  %v1407_v63 = vrot.slane %v1406_v58, 1 }
 0x1a9   :  { %v1021_v0 = vld [vmem:[#allocation3 + $0x8] sm:$0xff] }
 0x1aa   :  { %v1409_v1 = vmul.f32 0.03125, %v1399_v60  ;;  %1004 = vst.msk [vmem:[#allocation3 + $0x18] sm:$0xff] %vm175_vm0, %v999_v62  ;;  %v1045_v2 = vmul.f32 %v3652_v59, %v1021_v0  ;;  %v1408_v3 = vadd.f32 %v1407_v63, %v1406_v58  ;;  %v1071_v59 = vsel %vm175_vm0, %v1044_v57, 0.0 }
 0x1ac   :  { %v1411_v4 = vadd.f32 1e-05, %v1409_v1  ;;  %1066 = vst.msk [vmem:[%s4001_s19 + $0x8] sm:$0xff] %vm1064_vm2, %v1045_v2  ;;  %v1410_v51 = vmul.f32 0.03125, %v1408_v3  ;;  %v1072_v7 = vsel %vm175_vm0, %v1045_v2, 0.0 }
 0x1ad   :  { %v1022_v5 = vld [vmem:[#allocation3 + $0x10] sm:$0xff]  ;;  %v1073_v12 = vadd.f32 %v1072_v7, %v1071_v59 }
 0x1ae   :  { %v1046_v6 = vmul.f32 %v3650_v55, %v1022_v5  ;;  %v1412_v8 = vadd.f32 1e-05, %v1410_v51  ;;  %2838 = vrsqrt.f32 %v1411_v4 }
 0x1b0   :  { %1067 = vst.msk [vmem:[%s4001_s19 + $0x10] sm:$0xff] %vm1064_vm2, %v1046_v6  ;;  %v1074_v10 = vsel %vm175_vm0, %v1046_v6, 0.0  ;;  %2840 = vrsqrt.f32 %v1412_v8 }
 0x1b1   :  { %v1023_v11 = vld [vmem:[#allocation3 + $0x18] sm:$0xff]  ;;  %v1075_v14 = vadd.f32 %v1074_v10, %v1073_v12 }
 0x1b2   :  { %v1047_v13 = vmul.f32 %v3658_v9, %v1023_v11  ;;  %v3727_v9 = vsub.s32 %v1420_v25, %v3724_v24 }
 0x1b4   :  { %1068 = vst.msk [vmem:[%s4001_s19 + $0x18] sm:$0xff] %vm1064_vm2, %v1047_v13  ;;  %v1076_v55 = vsel %vm175_vm0, %v1047_v13, 0.0 }
 0x1b5   :  { %v1077_v22 = vadd.f32 %v1076_v55, %v1075_v14 }
 0x1b7   :  { %v1078_v23 = vrot.slane %v1077_v22, 4 }
 0x1b9   :  { %v1079_v26 = vadd.f32 %v1078_v23, %v1077_v22 }
 0x1bb   :  { %v1080_v27 = vrot.slane %v1079_v26, 2  ;;  %v2839_v28 = vpop.eup %2838 }
 0x1bd   :  { %v1081_v29 = vadd.f32 %v1080_v27, %v1079_v26  ;;  %v2841_v30 = vpop.eup %2840 }
 0x1be   :  { %v1417_v31 = vcombine.low %v2839_v28, %v2841_v30  ;;  %v2569_v28 = vld [vmem:[#allocation9] ss:$0 sm:$0xff] }
 0x1bf   :  { %v1082_v32 = vrot.slane %v1081_v29, 1 }
 0x1c0   :  { %v1424_v33 = vrot.slane %v1417_v31, %v3727_v9 }
 0x1c1   :  { %v1083_v34 = vadd.f32 %v1082_v32, %v1081_v29 }
 0x1c2   :  { %v1431_v49 = vrot.slane %v1424_v33, %v3727_v9 }
 0x1c3   :  { %v1085_v38 = vmul.f32 0.03125, %v1083_v34 }
 0x1c4   :  { %v1433_v39 = vmul.f32 %v1431_v49, %v1353_v35  ;;  %v1243_v49 = vld [vmem:[%s3990_s8 + $0x18] sm:$0xff] }
 0x1c5   :  { %v1086_v40 = vsub.f32 %v1044_v57, %v1085_v38  ;;  %v1087_v50 = vsub.f32 %v1045_v2, %v1085_v38  ;;  %v1088_v46 = vsub.f32 %v1046_v6, %v1085_v38  ;;  %v1089_v52 = vsub.f32 %v1047_v13, %v1085_v38  ;;  %2694 = vmatprep.subr.mxu1 %v1243_v49  ;;  %v1242_v38 = vld [vmem:[%s3990_s8 + $0x10] sm:$0xff] }
 0x1c6   :  { %v1438_v44 = vrot.slane %v1433_v39, %v3734_v36  ;;  %v1442_v19 = vrot.slane %v1433_v39, %v3738_v37  ;;  %v1241_v39 = vld [vmem:[%s3990_s8 + $0x8] sm:$0xff] }
 0x1c7   :  { %v1090_v56 = vmul.f32 %v1086_v40, %v1086_v40  ;;  %v1091_v63 = vmul.f32 %v1087_v50, %v1087_v50  ;;  %v1092_v1 = vmul.f32 %v1088_v46, %v1088_v46  ;;  %v1093_v3 = vmul.f32 %v1089_v52, %v1089_v52 }
 0x1c8   :  { %v1446_v58 = vmul.f32 %v1442_v19, %v3676_v18  ;;  %v1445_v60 = vmul.f32 %v1438_v44, %v3664_v41  ;;  %v1448_v62 = vmul.f32 %v1442_v19, %v3678_v20  ;;  %v1447_v2 = vmul.f32 %v1438_v44, %v3666_v42 }
 0x1c9   :  { %v1450_v51 = vmul.f32 %v1442_v19, %v3680_v54  ;;  %v1094_v18 = vsel %vm175_vm0, %v1090_v56, 0.0  ;;  %v1095_v41 = vsel %vm175_vm0, %v1091_v63, 0.0  ;;  %v1097_v5 = vsel %vm175_vm0, %v1092_v1, 0.0  ;;  %v1534_v56 = vld [vmem:[#allocation13 + $0x1f0] sm:$0xff]  ;;  %v1527_v1 = vld [vmem:[#allocation13 + $0x1b8] sm:$0xff] }
 0x1ca   :  { %v3747_v57 = vadd.f32 %v1461_v45, %v1446_v58  ;;  %v3749_v0 = vadd.f32 %v1457_v43, %v1445_v60  ;;  %v3753_v4 = vadd.f32 %v1461_v45, %v1448_v62  ;;  %v1096_v20 = vadd.f32 %v1095_v41, %v1094_v18  ;;  %v1531_v58 = vld [vmem:[#allocation13 + $0x1d8] sm:$0xff]  ;;  %v1530_v62 = vld [vmem:[#allocation13 + $0x1d0] sm:$0xff] }
 0x1cb   :  { %v3761_v6 = vadd.f32 %v1457_v43, %v1447_v2  ;;  %v1449_v42 = vmul.f32 %v1438_v44, %v3668_v48  ;;  %v3764_v8 = vadd.f32 %v1461_v45, %v1450_v51  ;;  %v1452_v54 = vmul.f32 %v1442_v19, %v3684_v61  ;;  %v1523_v51 = vld [vmem:[#allocation13 + $0x198] sm:$0xff]  ;;  %v1522_v18 = vld [vmem:[#allocation13 + $0x190] sm:$0xff] }
 0x1cc   :  { %1664 = vmatprep.mubr.f32.mxu0 %v3747_v57  ;;  %v1098_v7 = vadd.f32 %v1097_v5, %v1096_v20  ;;  %v1099_v59 = vsel %vm175_vm0, %v1093_v3, 0.0  ;;  %v1451_v12 = vmul.f32 %v1438_v44, %v3670_v17  ;;  %v1069_v17 = vld [vmem:[#allocation7] sm:$0x1]  ;;  %v2570_v44 = vld [vmem:[#allocation10] ss:$0 sm:$0xff]  ;;  %v1526_v3 = vld [vmem:[#allocation13 + $0x1b0] sm:$0xff] }
 0x1cd   :  { %1665 = vmatmul.mubr.f32.vlgmr.msra.gmra.mxu0 %v3749_v0  ;;  %v3770_v11 = vadd.f32 %v1457_v43, %v1449_v42  ;;  %v3773_v14 = vadd.f32 %v1461_v45, %v1452_v54  ;;  %v1519_v41 = vld [vmem:[#allocation13 + $0x178] sm:$0xff]  ;;  %v1518_v20 = vld [vmem:[#allocation13 + $0x170] sm:$0xff] }
 0x1ce   :  { %1670 = vmatprep.mubr.f32.mxu0 %v3753_v4  ;;  %v1100_v10 = vadd.f32 %v1099_v59, %v1098_v7  ;;  %v3777_v61 = vadd.f32 %v1457_v43, %v1451_v12  ;;  %v1515_v5 = vld [vmem:[#allocation13 + $0x158] sm:$0xff]  ;;  %v1514_v42 = vld [vmem:[#allocation13 + $0x150] sm:$0xff] }
 0x1cf   :  { %v1511_v7 = vld [vmem:[#allocation13 + $0x138] sm:$0xff]  ;;  %v1510_v54 = vld [vmem:[#allocation13 + $0x130] sm:$0xff] }
 0x1d0   :  { %v1101_v13 = vrot.slane %v1100_v10, 4  ;;  %v1507_v59 = vld [vmem:[#allocation13 + $0x118] sm:$0xff] }
 0x1d1   :  { %1671 = vmatmul.mubr.f32.gmra.mxu0 %v3761_v6  ;;  %v1503_v12 = vld [vmem:[#allocation13 + $0xf8] sm:$0xff] }
 0x1d2   :  { %1676 = vmatprep.mubr.f32.mxu0 %v3764_v8  ;;  %v1102_v48 = vadd.f32 %v1101_v13, %v1100_v10  ;;  %v1506_v10 = vld [vmem:[#allocation13 + $0x110] sm:$0xff] }
 0x1d3   :  { %v1502_v13 = vld [vmem:[#allocation13 + $0xf0] sm:$0xff] }
 0x1d4   :  { %v1103_v55 = vrot.slane %v1102_v48, 2 }
 0x1d5   :  { %1677 = vmatmul.mubr.f32.gmra.mxu0 %v3770_v11 }
 0x1d6   :  { %1682 = vmatprep.mubr.f32.mxu0 %v3773_v14  ;;  %v1104_v15 = vadd.f32 %v1103_v55, %v1102_v48  ;;  %v1498_v48 = vld [vmem:[#allocation13 + $0xd0] sm:$0xff]  ;;  %v1495_v55 = vld [vmem:[#allocation13 + $0xb8] sm:$0xff] }
 0x1d8   :  { %v1105_v16 = vrot.slane %v1104_v15, 1 }
 0x1d9   :  { %1683 = vmatmul.mubr.f32.gmra.mxu0 %v3777_v61 }
 0x1da   :  { %v1106_v21 = vadd.f32 %v1105_v16, %v1104_v15  ;;  %v1494_v15 = vld [vmem:[#allocation13 + $0xb0] sm:$0xff]  ;;  %v1491_v16 = vld [vmem:[#allocation13 + $0x98] sm:$0xff] }
 0x1dc   :  { %v1107_v22 = vmul.f32 0.03125, %v1106_v21  ;;  %v1490_v21 = vld [vmem:[#allocation13 + $0x90] sm:$0xff] }
 0x1de   :  { %v1108_v23 = vadd.f32 1e-05, %v1107_v22  ;;  %v1487_v22 = vld [vmem:[#allocation13 + $0x78] sm:$0xff] }
 0x1e0   :  { %2842 = vrsqrt.f32 %v1108_v23  ;;  %v1486_v23 = vld [vmem:[#allocation13 + $0x70] sm:$0xff] }
 0x1ed   :  { %v2843_v25 = vpop.eup %2842 }
 0x1ee   :  { %v1110_v26 = vmul.f32 %v2843_v25, %v1069_v17  ;;  %v1483_v17 = vld [vmem:[#allocation13 + $0x58] sm:$0xff]  ;;  %v1482_v25 = vld [vmem:[#allocation13 + $0x50] sm:$0xff] }
 0x1f0   :  { %v1115_v27 = vrot.slane %v1110_v26, %v3734_v36  ;;  %v1479_v26 = vld [vmem:[#allocation13 + $0x38] sm:$0xff] }
 0x1f2   :  { %v1117_v29 = vmul.f32 %v1115_v27, %v1086_v40  ;;  %v1118_v30 = vmul.f32 %v1115_v27, %v1087_v50  ;;  %v1119_v31 = vmul.f32 %v1115_v27, %v1088_v46  ;;  %v1120_v34 = vmul.f32 %v1115_v27, %v1089_v52  ;;  %v1240_v40 = vld [vmem:[%s3990_s8] sm:$0xff]  ;;  %v1478_v27 = vld [vmem:[#allocation13 + $0x30] sm:$0xff] }
 0x1f3   :  { %v1535_v50 = vld [vmem:[#allocation13 + $0x1f8] sm:$0xff] }
 0x1f4   :  { %v1127_v32 = vadd.f32 %v2569_v28, %v1117_v29  ;;  %v1128_v33 = vadd.f32 %v2569_v28, %v1118_v30  ;;  %v1129_v35 = vadd.f32 %v2569_v28, %v1119_v31  ;;  %v1130_v47 = vadd.f32 %v2569_v28, %v1120_v34  ;;  %v1475_v28 = vld [vmem:[#allocation13 + $0x18] sm:$0xff]  ;;  %v1474_v29 = vld [vmem:[#allocation13 + $0x10] sm:$0xff] }
 0x1f5   :  { %v1599_v30 = vld [vmem:[#allocation13 + $0x3f8] sm:$0xff]  ;;  %v1598_v31 = vld [vmem:[#allocation13 + $0x3f0] sm:$0xff] }
 0x1f6   :  { %2688 = vmatprep.mubr.msk.f32.mxu1 %vm175_vm0, %v1127_v32  ;;  %v1595_v32 = vld [vmem:[#allocation13 + $0x3d8] sm:$0xff] }
 0x1f7   :  { %2689 = vmatmul.mubr.msk.f32.vlgmr.msra.gmra.mxu1 %vm175_vm0, %v1128_v33  ;;  %v1594_v33 = vld [vmem:[#allocation13 + $0x3d0] sm:$0xff]  ;;  %v1591_v34 = vld [vmem:[#allocation13 + $0x3b8] sm:$0xff] }
 0x1f8   :  { %2691 = vmatprep.mubr.msk.f32.mxu1 %vm175_vm0, %v1129_v35  ;;  %2695 = vmatpush3.msra.mxu1 %v1243_v49  ;;  %v1590_v35 = vld [vmem:[#allocation13 + $0x3b0] sm:$0xff] }
 0x1f9   :  { %2696 = vmatprep.subr.mxu1 %v1242_v38  ;;  %v1586_v49 = vld [vmem:[#allocation13 + $0x390] sm:$0xff] }
 0x1fa   :  { %2697 = vmatpush3.msra.mxu1 %v1242_v38  ;;  %v1583_v38 = vld [vmem:[#allocation13 + $0x378] sm:$0xff] }
 0x1fb   :  { %2692 = vmatmul.mubr.msk.f32.gmra.mxu1 %vm175_vm0, %v1130_v47  ;;  %2698 = vmatprep.subr.mxu1 %v1241_v39  ;;  %v1587_v47 = vld [vmem:[#allocation13 + $0x398] sm:$0xff] }
 0x1fc   :  { %2699 = vmatpush3.msra.mxu1 %v1241_v39  ;;  %v1582_v39 = vld [vmem:[#allocation13 + $0x370] sm:$0xff] }
 0x1fd   :  { %2700 = vmatprep.subr.mxu1 %v1240_v40 }
 0x1fe   :  { %2701 = vmatpush3.msra.mxu1 %v1240_v40  ;;  %v1579_v40 = vld [vmem:[#allocation13 + $0x358] sm:$0xff] }
 0x1ff   :  { %1689 = vmatprep.subr.mxu1 %v1535_v50  ;;  %v1578_v50 = vld [vmem:[#allocation13 + $0x350] sm:$0xff] }
 0x2b7   :  { %v2690_v43 = vpop.f32.mrf.mxu1 }
 0x2b8   :  { %v1227_v46 = vadd.f32 %v2690_v43, %v2570_v44  ;;  %v1575_v43 = vld [vmem:[#allocation13 + $0x338] sm:$0xff] }
 0x2b9   :  { %v1221_v19 = vpop.f32.mrf.mxu1 }
 0x2ba   :  { %v1222_v45 = vadd.f32 %v2570_v44, %v1221_v19  ;;  %v1571_v19 = vld [vmem:[#allocation13 + $0x318] sm:$0xff] }
 0x2bb   :  { %v2693_v52 = vpop.f32.mrf.mxu1 }
 0x2bc   :  { %2702 = vmatprep.mubr.msk.f32.mxu1 %vm1251_vm3, %v1222_v45  ;;  %v1237_v2 = vadd.f32 %v2693_v52, %v2570_v44  ;;  %v1570_v45 = vld [vmem:[#allocation13 + $0x310] sm:$0xff] }
 0x2bd   :  { %v1231_v60 = vpop.f32.mrf.mxu1  ;;  %2703 = vmatmul.mubr.msk.f32.vlgmr.msra.gmra.mxu1 %vm1251_vm3, %v1227_v46  ;;  %v1567_v46 = vld [vmem:[#allocation13 + $0x2f8] sm:$0xff]  ;;  %v1566_v52 = vld [vmem:[#allocation13 + $0x2f0] sm:$0xff] }
 0x2be   :  { %v1232_v63 = vadd.f32 %v2570_v44, %v1231_v60  ;;  %1690 = vmatpush1.msra.mxu1 %v1534_v56  ;;  %v1574_v44 = vld [vmem:[#allocation13 + $0x330] sm:$0xff]  ;;  %v1563_v56 = vld [vmem:[#allocation13 + $0x2d8] sm:$0xff] }
 0x2bf   :  { %1691 = vmatprep.subr.mxu1 %v1531_v58  ;;  %v1562_v58 = vld [vmem:[#allocation13 + $0x2d0] sm:$0xff]  ;;  %v1559_v60 = vld [vmem:[#allocation13 + $0x2b8] sm:$0xff] }
 0x2c0   :  { %1692 = vmatpush1.msra.mxu1 %v1530_v62  ;;  %2705 = vmatprep.mubr.msk.f32.mxu1 %vm1251_vm3, %v1232_v63  ;;  %v1558_v62 = vld [vmem:[#allocation13 + $0x2b0] sm:$0xff]  ;;  %v1555_v63 = vld [vmem:[#allocation13 + $0x298] sm:$0xff] }
 0x2c1   :  { %1693 = vmatprep.subr.mxu1 %v1527_v1  ;;  %2706 = vmatmul.mubr.msk.f32.gmra.mxu1 %vm1251_vm3, %v1237_v2  ;;  %v1554_v1 = vld [vmem:[#allocation13 + $0x290] sm:$0xff]  ;;  %v1551_v2 = vld [vmem:[#allocation13 + $0x278] sm:$0xff] }
 0x2c2   :  { %1694 = vmatpush1.msra.mxu1 %v1526_v3  ;;  %1753 = vmatprep.mubr.f32.mxu1 %v3747_v57  ;;  %v1499_v57 = vld [vmem:[#allocation13 + $0xd8] sm:$0xff]  ;;  %v1550_v3 = vld [vmem:[#allocation13 + $0x270] sm:$0xff] }
 0x2c3   :  { %1695 = vmatprep.subr.mxu1 %v1523_v51  ;;  %v1547_v51 = vld [vmem:[#allocation13 + $0x258] sm:$0xff] }
 0x2c4   :  { %1696 = vmatpush1.msra.mxu1 %v1522_v18  ;;  %v1546_v18 = vld [vmem:[#allocation13 + $0x250] sm:$0xff] }
 0x2c5   :  { %1697 = vmatprep.subr.mxu1 %v1519_v41  ;;  %v1543_v41 = vld [vmem:[#allocation13 + $0x238] sm:$0xff] }
 0x2c6   :  { %1698 = vmatpush1.msra.mxu1 %v1518_v20  ;;  %v1542_v20 = vld [vmem:[#allocation13 + $0x230] sm:$0xff] }
 0x2c7   :  { %1699 = vmatprep.subr.mxu1 %v1515_v5  ;;  %v1539_v5 = vld [vmem:[#allocation13 + $0x218] sm:$0xff] }
 0x2c8   :  { %1700 = vmatpush1.msra.mxu1 %v1514_v42  ;;  %v1538_v42 = vld [vmem:[#allocation13 + $0x210] sm:$0xff] }
 0x2c9   :  { %1701 = vmatprep.subr.mxu1 %v1511_v7  ;;  %v2067_v7 = vld [vmem:[#allocation16 + $0xf8] sm:$0xff] }
 0x2ca   :  { %1702 = vmatpush1.msra.mxu1 %v1510_v54  ;;  %v2131_v54 = vld [vmem:[#allocation16 + $0x2f8] sm:$0xff]  ;;  %2164 = vmatprep.subr.mxu0 %v2067_v7  ;;  %v2102_v7 = vld [vmem:[#allocation16 + $0x210] sm:$0xff] }
 0x2cb   :  { %1703 = vmatprep.subr.mxu1 %v1507_v59  ;;  %v2066_v59 = vld [vmem:[#allocation16 + $0xf0] sm:$0xff] }
 0x2cc   :  { %1704 = vmatpush1.msra.mxu1 %v1506_v10  ;;  %v2130_v10 = vld [vmem:[#allocation16 + $0x2f0] sm:$0xff]  ;;  %2165 = vmatpush1.msra.mxu0 %v2066_v59  ;;  %v2101_v59 = vld [vmem:[#allocation16 + $0x208] sm:$0xff] }
 0x2cd   :  { %1705 = vmatprep.subr.mxu1 %v1503_v12  ;;  %v2126_v12 = vld [vmem:[#allocation16 + $0x2d0] sm:$0xff] }
 0x2ce   :  { %1706 = vmatpush1.msra.mxu1 %v1502_v13  ;;  %v2061_v13 = vld [vmem:[#allocation16 + $0xc8] sm:$0xff] }
 0x2cf   :  { %1707 = vmatprep.subr.mxu1 %v1499_v57  ;;  %v2125_v57 = vld [vmem:[#allocation16 + $0x2c8] sm:$0xff] }
 0x2d0   :  { %1708 = vmatpush1.msra.mxu1 %v1498_v48  ;;  %v2060_v48 = vld [vmem:[#allocation16 + $0xc0] sm:$0xff] }
 0x2d1   :  { %1709 = vmatprep.subr.mxu1 %v1495_v55  ;;  %v2124_v55 = vld [vmem:[#allocation16 + $0x2c0] sm:$0xff] }
 0x2d2   :  { %1710 = vmatpush1.msra.mxu1 %v1494_v15  ;;  %v2059_v15 = vld [vmem:[#allocation16 + $0xb8] sm:$0xff] }
 0x2d3   :  { %1711 = vmatprep.subr.mxu1 %v1491_v16  ;;  %v2123_v16 = vld [vmem:[#allocation16 + $0x2b8] sm:$0xff] }
 0x2d4   :  { %1712 = vmatpush1.msra.mxu1 %v1490_v21  ;;  %v2058_v21 = vld [vmem:[#allocation16 + $0xb0] sm:$0xff] }
 0x2d5   :  { %1713 = vmatprep.subr.mxu1 %v1487_v22  ;;  %v2122_v22 = vld [vmem:[#allocation16 + $0x2b0] sm:$0xff] }
 0x2d6   :  { %1714 = vmatpush1.msra.mxu1 %v1486_v23  ;;  %v2057_v23 = vld [vmem:[#allocation16 + $0xa8] sm:$0xff] }
 0x2d7   :  { %1715 = vmatprep.subr.mxu1 %v1483_v17  ;;  %v2121_v17 = vld [vmem:[#allocation16 + $0x2a8] sm:$0xff] }
 0x2d8   :  { %1716 = vmatpush1.msra.mxu1 %v1482_v25  ;;  %v2056_v25 = vld [vmem:[#allocation16 + $0xa0] sm:$0xff] }
 0x2d9   :  { %1717 = vmatprep.subr.mxu1 %v1479_v26  ;;  %v2120_v26 = vld [vmem:[#allocation16 + $0x2a0] sm:$0xff] }
 0x2da   :  { %1718 = vmatpush1.msra.mxu1 %v1478_v27  ;;  %v2055_v27 = vld [vmem:[#allocation16 + $0x98] sm:$0xff] }
 0x2db   :  { %1719 = vmatprep.subr.mxu1 %v1475_v28  ;;  %v2119_v28 = vld [vmem:[#allocation16 + $0x298] sm:$0xff] }
 0x2dc   :  { %1720 = vmatpush1.msra.mxu1 %v1474_v29  ;;  %v2054_v29 = vld [vmem:[#allocation16 + $0x90] sm:$0xff] }
 0x2dd   :  { %1721 = vmatprep.subr.mxu1 %v1599_v30  ;;  %v2118_v30 = vld [vmem:[#allocation16 + $0x290] sm:$0xff] }
 0x2de   :  { %1722 = vmatpush2.msra.mxu1 %v1598_v31  ;;  %v2053_v31 = vld [vmem:[#allocation16 + $0x88] sm:$0xff] }
 0x2df   :  { %1723 = vmatprep.subr.mxu1 %v1595_v32  ;;  %v2117_v32 = vld [vmem:[#allocation16 + $0x288] sm:$0xff] }
 0x2e0   :  { %1724 = vmatpush2.msra.mxu1 %v1594_v33  ;;  %v2052_v33 = vld [vmem:[#allocation16 + $0x80] sm:$0xff] }
 0x2e1   :  { %1725 = vmatprep.subr.mxu1 %v1591_v34  ;;  %v2116_v34 = vld [vmem:[#allocation16 + $0x280] sm:$0xff] }
 0x2e2   :  { %1726 = vmatpush2.msra.mxu1 %v1590_v35  ;;  %v2051_v35 = vld [vmem:[#allocation16 + $0x78] sm:$0xff] }
 0x2e3   :  { %1727 = vmatprep.subr.mxu1 %v1587_v47  ;;  %v2115_v47 = vld [vmem:[#allocation16 + $0x278] sm:$0xff] }
 0x2e4   :  { %1728 = vmatpush2.msra.mxu1 %v1586_v49  ;;  %v2050_v49 = vld [vmem:[#allocation16 + $0x70] sm:$0xff] }
 0x2e5   :  { %1729 = vmatprep.subr.mxu1 %v1583_v38  ;;  %v2114_v38 = vld [vmem:[#allocation16 + $0x270] sm:$0xff] }
 0x2e6   :  { %1730 = vmatpush2.msra.mxu1 %v1582_v39  ;;  %v2049_v39 = vld [vmem:[#allocation16 + $0x68] sm:$0xff] }
 0x2e7   :  { %1731 = vmatprep.subr.mxu1 %v1579_v40  ;;  %v2113_v40 = vld [vmem:[#allocation16 + $0x268] sm:$0xff] }
 0x2e8   :  { %1732 = vmatpush2.msra.mxu1 %v1578_v50  ;;  %v2048_v50 = vld [vmem:[#allocation16 + $0x60] sm:$0xff] }
 0x2e9   :  { %1733 = vmatprep.subr.mxu1 %v1575_v43  ;;  %v2112_v43 = vld [vmem:[#allocation16 + $0x260] sm:$0xff] }
 0x2ea   :  { %1734 = vmatpush2.msra.mxu1 %v1574_v44  ;;  %v2047_v44 = vld [vmem:[#allocation16 + $0x58] sm:$0xff] }
 0x2eb   :  { %1735 = vmatprep.subr.mxu1 %v1571_v19  ;;  %v2111_v19 = vld [vmem:[#allocation16 + $0x258] sm:$0xff] }
 0x2ec   :  { %1736 = vmatpush2.msra.mxu1 %v1570_v45  ;;  %v2046_v45 = vld [vmem:[#allocation16 + $0x50] sm:$0xff] }
 0x2ed   :  { %1737 = vmatprep.subr.mxu1 %v1567_v46  ;;  %v2110_v46 = vld [vmem:[#allocation16 + $0x250] sm:$0xff] }
 0x2ee   :  { %1738 = vmatpush2.msra.mxu1 %v1566_v52  ;;  %v2045_v52 = vld [vmem:[#allocation16 + $0x48] sm:$0xff] }
 0x2ef   :  { %1739 = vmatprep.subr.mxu1 %v1563_v56  ;;  %v2109_v56 = vld [vmem:[#allocation16 + $0x248] sm:$0xff] }
 0x2f0   :  { %1740 = vmatpush2.msra.mxu1 %v1562_v58  ;;  %v2044_v58 = vld [vmem:[#allocation16 + $0x40] sm:$0xff] }
 0x2f1   :  { %1741 = vmatprep.subr.mxu1 %v1559_v60  ;;  %v2108_v60 = vld [vmem:[#allocation16 + $0x240] sm:$0xff] }
 0x2f2   :  { %1742 = vmatpush2.msra.mxu1 %v1558_v62  ;;  %v2043_v62 = vld [vmem:[#allocation16 + $0x38] sm:$0xff] }
 0x2f3   :  { %1743 = vmatprep.subr.mxu1 %v1555_v63  ;;  %v2107_v63 = vld [vmem:[#allocation16 + $0x238] sm:$0xff] }
 0x2f4   :  { %1744 = vmatpush2.msra.mxu1 %v1554_v1  ;;  %v2042_v1 = vld [vmem:[#allocation16 + $0x30] sm:$0xff] }
 0x2f5   :  { %1745 = vmatprep.subr.mxu1 %v1551_v2  ;;  %v2106_v2 = vld [vmem:[#allocation16 + $0x230] sm:$0xff] }
 0x2f6   :  { %1746 = vmatpush2.msra.mxu1 %v1550_v3  ;;  %v2041_v3 = vld [vmem:[#allocation16 + $0x28] sm:$0xff] }
 0x2f7   :  { %1747 = vmatprep.subr.mxu1 %v1547_v51  ;;  %v2105_v51 = vld [vmem:[#allocation16 + $0x228] sm:$0xff] }
 0x2f8   :  { %1748 = vmatpush2.msra.mxu1 %v1546_v18  ;;  %v2040_v18 = vld [vmem:[#allocation16 + $0x20] sm:$0xff] }
 0x2f9   :  { %1749 = vmatprep.subr.mxu1 %v1543_v41  ;;  %v2104_v41 = vld [vmem:[#allocation16 + $0x220] sm:$0xff] }
 0x2fa   :  { %1750 = vmatpush2.msra.mxu1 %v1542_v20  ;;  %v2039_v20 = vld [vmem:[#allocation16 + $0x18] sm:$0xff] }
 0x2fb   :  { %1751 = vmatprep.subr.mxu1 %v1539_v5  ;;  %v2103_v5 = vld [vmem:[#allocation16 + $0x218] sm:$0xff] }
 0x2fc   :  { %1752 = vmatpush2.msra.mxu1 %v1538_v42  ;;  %v2038_v42 = vld [vmem:[#allocation16 + $0x10] sm:$0xff] }
 0x2fd   :  { %1754 = vmatmul.mubr.f32.vlgmr.msra.gmra.mxu1 %v3749_v0  ;;  %2253 = vmatprep.subr.mxu1 %v2131_v54  ;;  %v2065_v0 = vld [vmem:[#allocation16 + $0xe8] sm:$0xff] }
 0x2fe   :  { %1759 = vmatprep.mubr.f32.mxu1 %v3753_v4  ;;  %2254 = vmatpush1.msra.mxu1 %v2130_v10  ;;  %v2129_v4 = vld [vmem:[#allocation16 + $0x2e8] sm:$0xff]  ;;  %v2036_v10 = vld [vmem:[#allocation16] sm:$0xff] }
 0x2ff   :  { %2166 = vmatprep.subr.mxu0 %v2065_v0  ;;  %2255 = vmatprep.subr.mxu1 %v2129_v4  ;;  %v2037_v54 = vld [vmem:[#allocation16 + $0x8] sm:$0xff]  ;;  %v2100_v0 = vld [vmem:[#allocation16 + $0x200] sm:$0xff]  ;;  %v2099_v4 = vld [vmem:[#allocation16 + $0x1f8] sm:$0xff] }
 0x301   :  { %1760 = vmatmul.mubr.f32.gmra.mxu1 %v3761_v6  ;;  %v2064_v6 = vld [vmem:[#allocation16 + $0xe0] sm:$0xff] }
 0x302   :  { %1765 = vmatprep.mubr.f32.mxu1 %v3764_v8  ;;  %v2128_v8 = vld [vmem:[#allocation16 + $0x2e0] sm:$0xff]  ;;  %2167 = vmatpush1.msra.mxu0 %v2064_v6  ;;  %v2163_v6 = vld [vmem:[#allocation16 + $0x3f8] sm:$0xff] }
 0x303   :  { %2256 = vmatpush1.msra.mxu1 %v2128_v8  ;;  %v2098_v8 = vld [vmem:[#allocation16 + $0x1f0] sm:$0xff] }
 0x305   :  { %1766 = vmatmul.mubr.f32.gmra.mxu1 %v3770_v11  ;;  %v2063_v11 = vld [vmem:[#allocation16 + $0xd8] sm:$0xff] }
 0x306   :  { %1771 = vmatprep.mubr.f32.mxu1 %v3773_v14  ;;  %v2127_v14 = vld [vmem:[#allocation16 + $0x2d8] sm:$0xff]  ;;  %2168 = vmatprep.subr.mxu0 %v2063_v11  ;;  %v2162_v11 = vld [vmem:[#allocation16 + $0x3f0] sm:$0xff] }
 0x307   :  { %2257 = vmatprep.subr.mxu1 %v2127_v14  ;;  %v2097_v14 = vld [vmem:[#allocation16 + $0x1e8] sm:$0xff] }
 0x308   :  { %2258 = vmatpush1.msra.mxu1 %v2126_v12  ;;  %v2096_v12 = vld [vmem:[#allocation16 + $0x1e0] sm:$0xff] }
 0x309   :  { %1772 = vmatmul.mubr.f32.gmra.mxu1 %v3777_v61  ;;  %v2062_v61 = vld [vmem:[#allocation16 + $0xd0] sm:$0xff]  ;;  %2259 = vmatprep.subr.mxu1 %v2125_v57  ;;  %v2095_v57 = vld [vmem:[#allocation16 + $0x1d8] sm:$0xff] }
 0x30a   :  { %2169 = vmatpush1.msra.mxu0 %v2062_v61  ;;  %2260 = vmatpush1.msra.mxu1 %v2124_v55  ;;  %v2161_v61 = vld [vmem:[#allocation16 + $0x3e8] sm:$0xff]  ;;  %v2094_v55 = vld [vmem:[#allocation16 + $0x1d0] sm:$0xff] }
 0x30b   :  { %2170 = vmatprep.subr.mxu0 %v2061_v13  ;;  %2261 = vmatprep.subr.mxu1 %v2123_v16  ;;  %v2160_v13 = vld [vmem:[#allocation16 + $0x3e0] sm:$0xff]  ;;  %v2093_v16 = vld [vmem:[#allocation16 + $0x1c8] sm:$0xff] }
 0x30c   :  { %2171 = vmatpush1.msra.mxu0 %v2060_v48  ;;  %2262 = vmatpush1.msra.mxu1 %v2122_v22  ;;  %v2159_v48 = vld [vmem:[#allocation16 + $0x3d8] sm:$0xff]  ;;  %v2092_v22 = vld [vmem:[#allocation16 + $0x1c0] sm:$0xff] }
 0x30d   :  { %2172 = vmatprep.subr.mxu0 %v2059_v15  ;;  %2263 = vmatprep.subr.mxu1 %v2121_v17  ;;  %v2158_v15 = vld [vmem:[#allocation16 + $0x3d0] sm:$0xff]  ;;  %v2091_v17 = vld [vmem:[#allocation16 + $0x1b8] sm:$0xff] }
 0x30e   :  { %2173 = vmatpush1.msra.mxu0 %v2058_v21  ;;  %2264 = vmatpush1.msra.mxu1 %v2120_v26  ;;  %v2157_v21 = vld [vmem:[#allocation16 + $0x3c8] sm:$0xff]  ;;  %v3809_v26 = vpop.f32.mrf.mxu0 }
 0x30f   :  { %2174 = vmatprep.subr.mxu0 %v2057_v23  ;;  %2265 = vmatprep.subr.mxu1 %v2119_v28  ;;  %v2156_v23 = vld [vmem:[#allocation16 + $0x3c0] sm:$0xff]  ;;  %v2154_v28 = vld [vmem:[#allocation16 + $0x3b0] sm:$0xff] }
 0x310   :  { %2175 = vmatpush1.msra.mxu0 %v2056_v25  ;;  %2266 = vmatpush1.msra.mxu1 %v2118_v30  ;;  %v2155_v25 = vld [vmem:[#allocation16 + $0x3b8] sm:$0xff]  ;;  %v2153_v30 = vld [vmem:[#allocation16 + $0x3a8] sm:$0xff] }
 0x311   :  { %2176 = vmatprep.subr.mxu0 %v2055_v27  ;;  %2267 = vmatprep.subr.mxu1 %v2117_v32  ;;  %v2090_v27 = vld [vmem:[#allocation16 + $0x1b0] sm:$0xff]  ;;  %v2152_v32 = vld [vmem:[#allocation16 + $0x3a0] sm:$0xff] }
 0x312   :  { %2177 = vmatpush1.msra.mxu0 %v2054_v29  ;;  %2268 = vmatpush1.msra.mxu1 %v2116_v34  ;;  %v2089_v29 = vld [vmem:[#allocation16 + $0x1a8] sm:$0xff]  ;;  %v2151_v34 = vld [vmem:[#allocation16 + $0x398] sm:$0xff] }
 0x313   :  { %2178 = vmatprep.subr.mxu0 %v2053_v31  ;;  %2269 = vmatprep.subr.mxu1 %v2115_v47  ;;  %v2088_v31 = vld [vmem:[#allocation16 + $0x1a0] sm:$0xff]  ;;  %v2086_v47 = vld [vmem:[#allocation16 + $0x190] sm:$0xff] }
 0x314   :  { %2179 = vmatpush1.msra.mxu0 %v2052_v33  ;;  %2270 = vmatpush1.msra.mxu1 %v2114_v38  ;;  %v2087_v33 = vld [vmem:[#allocation16 + $0x198] sm:$0xff]  ;;  %v2085_v38 = vld [vmem:[#allocation16 + $0x188] sm:$0xff] }
 0x315   :  { %2180 = vmatprep.subr.mxu0 %v2051_v35  ;;  %2271 = vmatprep.subr.mxu1 %v2113_v40  ;;  %v3811_v35 = vpop.f32.mrf.mxu0  ;;  %v2084_v40 = vld [vmem:[#allocation16 + $0x180] sm:$0xff] }
 0x316   :  { %2181 = vmatpush1.msra.mxu0 %v2050_v49  ;;  %2272 = vmatpush1.msra.mxu1 %v2112_v43  ;;  %v2150_v49 = vld [vmem:[#allocation16 + $0x390] sm:$0xff]  ;;  %v2083_v43 = vld [vmem:[#allocation16 + $0x178] sm:$0xff] }
 0x317   :  { %2182 = vmatprep.subr.mxu0 %v2049_v39  ;;  %2273 = vmatprep.subr.mxu1 %v2111_v19  ;;  %v2149_v39 = vld [vmem:[#allocation16 + $0x388] sm:$0xff]  ;;  %v3813_v19 = vpop.f32.mrf.mxu0 }
 0x318   :  { %2183 = vmatpush1.msra.mxu0 %v2048_v50  ;;  %2274 = vmatpush1.msra.mxu1 %v2110_v46  ;;  %v2148_v50 = vld [vmem:[#allocation16 + $0x380] sm:$0xff]  ;;  %v2146_v46 = vld [vmem:[#allocation16 + $0x370] sm:$0xff] }
 0x319   :  { %2184 = vmatprep.subr.mxu0 %v2047_v44  ;;  %2275 = vmatprep.subr.mxu1 %v2109_v56  ;;  %v2147_v44 = vld [vmem:[#allocation16 + $0x378] sm:$0xff]  ;;  %v2145_v56 = vld [vmem:[#allocation16 + $0x368] sm:$0xff] }
 0x31a   :  { %2185 = vmatpush1.msra.mxu0 %v2046_v45  ;;  %2276 = vmatpush1.msra.mxu1 %v2108_v60  ;;  %v2082_v45 = vld [vmem:[#allocation16 + $0x170] sm:$0xff]  ;;  %v2144_v60 = vld [vmem:[#allocation16 + $0x360] sm:$0xff] }
 0x31b   :  { %2186 = vmatprep.subr.mxu0 %v2045_v52  ;;  %2277 = vmatprep.subr.mxu1 %v2107_v63  ;;  %v2081_v52 = vld [vmem:[#allocation16 + $0x168] sm:$0xff]  ;;  %v2143_v63 = vld [vmem:[#allocation16 + $0x358] sm:$0xff] }
 0x31c   :  { %2187 = vmatpush1.msra.mxu0 %v2044_v58  ;;  %2278 = vmatpush1.msra.mxu1 %v2106_v2  ;;  %v2080_v58 = vld [vmem:[#allocation16 + $0x160] sm:$0xff]  ;;  %v2078_v2 = vld [vmem:[#allocation16 + $0x150] sm:$0xff] }
 0x31d   :  { %2188 = vmatprep.subr.mxu0 %v2043_v62  ;;  %2279 = vmatprep.subr.mxu1 %v2105_v51  ;;  %v2079_v62 = vld [vmem:[#allocation16 + $0x158] sm:$0xff]  ;;  %v2077_v51 = vld [vmem:[#allocation16 + $0x148] sm:$0xff] }
 0x31e   :  { %2189 = vmatpush1.msra.mxu0 %v2042_v1  ;;  %2280 = vmatpush1.msra.mxu1 %v2104_v41  ;;  %v3815_v1 = vpop.f32.mrf.mxu0  ;;  %v2076_v41 = vld [vmem:[#allocation16 + $0x140] sm:$0xff] }
 0x31f   :  { %2190 = vmatprep.subr.mxu0 %v2041_v3  ;;  %2281 = vmatprep.subr.mxu1 %v2103_v5  ;;  %v2142_v3 = vld [vmem:[#allocation16 + $0x350] sm:$0xff]  ;;  %v2075_v5 = vld [vmem:[#allocation16 + $0x138] sm:$0xff] }
 0x320   :  { %2191 = vmatpush1.msra.mxu0 %v2040_v18  ;;  %2282 = vmatpush1.msra.mxu1 %v2102_v7  ;;  %v2141_v18 = vld [vmem:[#allocation16 + $0x348] sm:$0xff]  ;;  %v3817_v7 = vpop.f32.mrf.mxu0 }
 0x321   :  { %2192 = vmatprep.subr.mxu0 %v2039_v20  ;;  %2283 = vmatprep.subr.mxu1 %v2101_v59  ;;  %v2140_v20 = vld [vmem:[#allocation16 + $0x340] sm:$0xff]  ;;  %v2138_v59 = vld [vmem:[#allocation16 + $0x330] sm:$0xff] }
 0x322   :  { %2193 = vmatpush1.msra.mxu0 %v2038_v42  ;;  %2284 = vmatpush1.msra.mxu1 %v2100_v0  ;;  %v2139_v42 = vld [vmem:[#allocation16 + $0x338] sm:$0xff]  ;;  %v2072_v0 = vld [vmem:[#allocation16 + $0x120] sm:$0xff] }
 0x323   :  { %2194 = vmatprep.subr.mxu0 %v2037_v54  ;;  %2285 = vmatprep.subr.mxu1 %v2163_v6  ;;  %v2074_v54 = vld [vmem:[#allocation16 + $0x130] sm:$0xff]  ;;  %v2071_v6 = vld [vmem:[#allocation16 + $0x118] sm:$0xff] }
 0x324   :  { %2195 = vmatpush1.msra.mxu0 %v2036_v10  ;;  %2286 = vmatpush2.msra.mxu1 %v2162_v11  ;;  %v2073_v10 = vld [vmem:[#allocation16 + $0x128] sm:$0xff]  ;;  %v2070_v11 = vld [vmem:[#allocation16 + $0x110] sm:$0xff] }
 0x325   :  { %2196 = vmatprep.subr.mxu0 %v2099_v4  ;;  %2287 = vmatprep.subr.mxu1 %v2161_v61  ;;  %v2137_v4 = vld [vmem:[#allocation16 + $0x328] sm:$0xff] }
 0x326   :  { %2197 = vmatpush2.msra.mxu0 %v2098_v8  ;;  %2288 = vmatpush2.msra.mxu1 %v2160_v13  ;;  %v2136_v8 = vld [vmem:[#allocation16 + $0x320] sm:$0xff]  ;;  %v2069_v61 = vld [vmem:[#allocation16 + $0x108] sm:$0xff]  ;;  %v1680_v13 = vpop.f32.mrf.mxu0 }
 0x327   :  { %2198 = vmatprep.subr.mxu0 %v2097_v14  ;;  %2289 = vmatprep.subr.mxu1 %v2159_v48  ;;  %v2135_v14 = vld [vmem:[#allocation16 + $0x318] sm:$0xff]  ;;  %v2133_v48 = vld [vmem:[#allocation16 + $0x308] sm:$0xff] }
 0x328   :  { %2199 = vmatpush2.msra.mxu0 %v2096_v12  ;;  %2290 = vmatpush2.msra.mxu1 %v2158_v15  ;;  %v2134_v12 = vld [vmem:[#allocation16 + $0x310] sm:$0xff]  ;;  %v2035_v15 = vld [vmem:[#allocation15 + $0x78] sm:$0xff] }
 0x329   :  { %2200 = vmatprep.subr.mxu0 %v2095_v57  ;;  %2291 = vmatprep.subr.mxu1 %v2157_v21  ;;  %v2068_v57 = vld [vmem:[#allocation16 + $0x100] sm:$0xff]  ;;  %v1789_v21 = vadd.f32 %v3815_v1, %v3811_v35 }
 0x32a   :  { %2201 = vmatpush2.msra.mxu0 %v2094_v55  ;;  %2292 = vmatpush2.msra.mxu1 %v2156_v23  ;;  %v2132_v55 = vld [vmem:[#allocation16 + $0x300] sm:$0xff]  ;;  %v1780_v23 = vadd.f32 %v3813_v19, %v3809_v26 }
 0x32b   :  { %2202 = vmatprep.subr.mxu0 %v2093_v16  ;;  %2293 = vmatprep.subr.mxu1 %v2155_v25  ;;  %v1684_v16 = vpop.f32.mrf.mxu0 }
 0x32c   :  { %2203 = vmatpush2.msra.mxu0 %v2092_v22  ;;  %2294 = vmatpush2.msra.mxu1 %v2154_v28  ;;  %v1781_v25 = vadd.f32 %v1780_v23, %v3817_v7 }
 0x32d   :  { %2204 = vmatprep.subr.mxu0 %v2091_v17  ;;  %2295 = vmatprep.subr.mxu1 %v2153_v30  ;;  %v1686_v22 = vpop.f32.mrf.mxu0  ;;  %v1790_v17 = vadd.f32 %v1789_v21, %v1680_v13 }
 0x32e   :  { %2205 = vmatpush2.msra.mxu0 %v2090_v27  ;;  %2296 = vmatpush2.msra.mxu1 %v2152_v32  ;;  %v1782_v28 = vadd.f32 %v1781_v25, %v1684_v16 }
 0x32f   :  { %2206 = vmatprep.subr.mxu0 %v2089_v29  ;;  %2297 = vmatprep.subr.mxu1 %v2151_v34  ;;  %v1791_v27 = vadd.f32 %v1790_v17, %v1686_v22 }
 0x330   :  { %2207 = vmatpush2.msra.mxu0 %v2088_v31  ;;  %2298 = vmatpush2.msra.mxu1 %v2150_v49  ;;  %v1783_v30 = vrot.slane %v1782_v28, 4 }
 0x331   :  { %2208 = vmatprep.subr.mxu0 %v2087_v33  ;;  %2299 = vmatprep.subr.mxu1 %v2149_v39  ;;  %v1792_v29 = vrot.slane %v1791_v27, 4 }
 0x332   :  { %2209 = vmatpush2.msra.mxu0 %v2086_v47  ;;  %2300 = vmatpush2.msra.mxu1 %v2148_v50  ;;  %v1784_v32 = vadd.f32 %v1783_v30, %v1782_v28 }
 0x333   :  { %2210 = vmatprep.subr.mxu0 %v2085_v38  ;;  %2301 = vmatprep.subr.mxu1 %v2147_v44  ;;  %v1793_v31 = vadd.f32 %v1792_v29, %v1791_v27 }
 0x334   :  { %2211 = vmatpush2.msra.mxu0 %v2084_v40  ;;  %2302 = vmatpush2.msra.mxu1 %v2146_v46  ;;  %v1785_v34 = vrot.slane %v1784_v32, 2 }
 0x335   :  { %2212 = vmatprep.subr.mxu0 %v2083_v43  ;;  %2303 = vmatprep.subr.mxu1 %v2145_v56  ;;  %v1794_v33 = vrot.slane %v1793_v31, 2 }
 0x336   :  { %2213 = vmatpush2.msra.mxu0 %v2082_v45  ;;  %2304 = vmatpush2.msra.mxu1 %v2144_v60  ;;  %v1786_v38 = vadd.f32 %v1785_v34, %v1784_v32 }
 0x337   :  { %2214 = vmatprep.subr.mxu0 %v2081_v52  ;;  %2305 = vmatprep.subr.mxu1 %v2143_v63  ;;  %v1795_v47 = vadd.f32 %v1794_v33, %v1793_v31 }
 0x338   :  { %2215 = vmatpush2.msra.mxu0 %v2080_v58  ;;  %2306 = vmatpush2.msra.mxu1 %v2142_v3  ;;  %v1787_v50 = vrot.slane %v1786_v38, 1 }
 0x339   :  { %2216 = vmatprep.subr.mxu0 %v2079_v62  ;;  %2307 = vmatprep.subr.mxu1 %v2141_v18  ;;  %v1796_v39 = vrot.slane %v1795_v47, 1 }
 0x33a   :  { %2217 = vmatpush2.msra.mxu0 %v2078_v2  ;;  %2308 = vmatpush2.msra.mxu1 %v2140_v20  ;;  %v1788_v45 = vadd.f32 %v1787_v50, %v1786_v38 }
 0x33b   :  { %2218 = vmatprep.subr.mxu0 %v2077_v51  ;;  %2309 = vmatprep.subr.mxu1 %v2139_v42  ;;  %v1797_v43 = vadd.f32 %v1796_v39, %v1795_v47 }
 0x33c   :  { %2219 = vmatpush2.msra.mxu0 %v2076_v41  ;;  %2310 = vmatpush2.msra.mxu1 %v2138_v59  ;;  %v1816_v56 = vmul.f32 0.03125, %v1788_v45 }
 0x33d   :  { %2220 = vmatprep.subr.mxu0 %v2075_v5  ;;  %2311 = vmatprep.subr.mxu1 %v2137_v4  ;;  %v1817_v46 = vmul.f32 0.03125, %v1797_v43 }
 0x33e   :  { %2221 = vmatpush2.msra.mxu0 %v2074_v54  ;;  %2312 = vmatpush2.msra.mxu1 %v2136_v8  ;;  %v3839_v2 = vsub.f32 %v3809_v26, %v1816_v56  ;;  %v3842_v3 = vsub.f32 %v3813_v19, %v1816_v56  ;;  %v3855_v19 = vsub.f32 %v3817_v7, %v1816_v56 }
 0x33f   :  { %2222 = vmatprep.subr.mxu0 %v2073_v10  ;;  %2313 = vmatprep.subr.mxu1 %v2135_v14  ;;  %v3833_v60 = vsub.f32 %v3811_v35, %v1817_v46  ;;  %v3836_v62 = vsub.f32 %v3815_v1, %v1817_v46  ;;  %v3852_v5 = vsub.f32 %v1680_v13, %v1817_v46 }
 0x340   :  { %2223 = vmatpush2.msra.mxu0 %v2072_v0  ;;  %2314 = vmatpush2.msra.mxu1 %v2134_v12  ;;  %v1836_v35 = vmul.f32 %v3839_v2, %v3839_v2  ;;  %v1840_v1 = vmul.f32 %v3842_v3, %v3842_v3  ;;  %v3861_v12 = vsub.f32 %v1684_v16, %v1816_v56 }
 0x341   :  { %2224 = vmatprep.subr.mxu0 %v2071_v6  ;;  %2315 = vmatprep.subr.mxu1 %v2133_v48  ;;  %v1837_v18 = vmul.f32 %v3833_v60, %v3833_v60  ;;  %v1841_v41 = vmul.f32 %v3836_v62, %v3836_v62  ;;  %v3857_v6 = vsub.f32 %v1686_v22, %v1817_v46 }
 0x342   :  { %2225 = vmatpush2.msra.mxu0 %v2070_v11  ;;  %2316 = vmatpush2.msra.mxu1 %v2132_v55  ;;  %v1852_v4 = vadd.f32 %v1840_v1, %v1836_v35  ;;  %v1845_v8 = vmul.f32 %v3852_v5, %v3852_v5  ;;  %v1844_v13 = vmul.f32 %v3855_v19, %v3855_v19 }
 0x343   :  { %2226 = vmatprep.subr.mxu0 %v2069_v61  ;;  %v1861_v54 = vadd.f32 %v1841_v41, %v1837_v18  ;;  %v1849_v21 = vmul.f32 %v3857_v6, %v3857_v6  ;;  %v1848_v17 = vmul.f32 %v3861_v12, %v3861_v12 }
 0x344   :  { %2227 = vmatpush2.msra.mxu0 %v2068_v57 }
 0x345   :  { %2371 = vmatprep.subr.mxu0 %v2035_v15  ;;  %v1862_v7 = vadd.f32 %v1861_v54, %v1845_v8  ;;  %v1853_v15 = vadd.f32 %v1852_v4, %v1844_v13 }
 0x347   :  { %v1863_v25 = vadd.f32 %v1862_v7, %v1849_v21  ;;  %v1854_v28 = vadd.f32 %v1853_v15, %v1848_v17 }
 0x349   :  { %v1864_v31 = vrot.slane %v1863_v25, 4  ;;  %v1855_v34 = vrot.slane %v1854_v28, 4 }
 0x34b   :  { %v1865_v39 = vadd.f32 %v1864_v31, %v1863_v25  ;;  %v1856_v45 = vadd.f32 %v1855_v34, %v1854_v28 }
 0x34d   :  { %v1866_v41 = vrot.slane %v1865_v39, 2 }
 0x34f   :  { %v1867_v8 = vadd.f32 %v1866_v41, %v1865_v39 }
 0x37d   :  { %v3824_v49 = vpop.f32.mrf.mxu1 }
 0x37f   :  { %v3826_v40 = vpop.f32.mrf.mxu1 }
 0x381   :  { %v3828_v44 = vpop.f32.mrf.mxu1 }
 0x383   :  { %v3830_v52 = vpop.f32.mrf.mxu1 }
 0x3bd   :  { %v1755_v58 = vpop.f32.mrf.mxu1 }
 0x3bf   :  { %v1757_v63 = vpop.f32.mrf.mxu1 }
 0x3c1   :  { %v1761_v51 = vpop.f32.mrf.mxu1 }
 0x3c2   :  { %v1798_v42 = vadd.f32 %v1761_v51, %v1755_v58 }
 0x3c3   :  { %v1763_v20 = vpop.f32.mrf.mxu1 }
 0x3c4   :  { %v1807_v10 = vadd.f32 %v1763_v20, %v1757_v63 }
 0x3c5   :  { %v1767_v26 = vpop.f32.mrf.mxu1 }
 0x3c6   :  { %v1799_v0 = vadd.f32 %v1798_v42, %v1767_v26 }
 0x3c7   :  { %v1769_v59 = vpop.f32.mrf.mxu1 }
 0x3c8   :  { %v1808_v14 = vadd.f32 %v1807_v10, %v1769_v59  ;;  %v1857_v10 = vrot.slane %v1856_v45, 2 }
 0x3c9   :  { %v1773_v11 = vpop.f32.mrf.mxu1 }
 0x3ca   :  { %v1800_v61 = vadd.f32 %v1799_v0, %v1773_v11  ;;  %v1858_v13 = vadd.f32 %v1857_v10, %v1856_v45 }
 0x3cb   :  { %v1775_v57 = vpop.f32.mrf.mxu1 }
 0x3cc   :  { %v1801_v48 = vrot.slane %v1800_v61, 4  ;;  %v1809_v55 = vadd.f32 %v1808_v14, %v1775_v57 }
 0x3ce   :  { %v1802_v22 = vadd.f32 %v1801_v48, %v1800_v61  ;;  %v1810_v23 = vrot.slane %v1809_v55, 4 }
 0x3d0   :  { %v1803_v27 = vrot.slane %v1802_v22, 2  ;;  %v1811_v16 = vadd.f32 %v1810_v23, %v1809_v55  ;;  %v1868_v55 = vrot.slane %v1867_v8, 1 }
 0x3d2   :  { %v1804_v29 = vadd.f32 %v1803_v27, %v1802_v22  ;;  %v1812_v30 = vrot.slane %v1811_v16, 2  ;;  %v1859_v22 = vrot.slane %v1858_v13, 1  ;;  %v1869_v25 = vadd.f32 %v1868_v55, %v1867_v8  ;;  %v1779_v55 = vld [vmem:[%s3996_s14] sm:$0xf] }
 0x3d4   :  { %v1805_v32 = vrot.slane %v1804_v29, 1  ;;  %v1813_v33 = vadd.f32 %v1812_v30, %v1811_v16  ;;  %v1860_v28 = vadd.f32 %v1859_v22, %v1858_v13  ;;  %v1889_v31 = vmul.f32 0.03125, %v1869_v25 }
 0x3d6   :  { %v1806_v47 = vadd.f32 %v1805_v32, %v1804_v29  ;;  %v1814_v38 = vrot.slane %v1813_v33, 1  ;;  %v1888_v34 = vmul.f32 0.03125, %v1860_v28  ;;  %v1893_v39 = vadd.f32 1e-05, %v1889_v31 }
 0x3d8   :  { %v1818_v50 = vmul.f32 0.03125, %v1806_v47  ;;  %v1815_v43 = vadd.f32 %v1814_v38, %v1813_v33  ;;  %v1892_v45 = vadd.f32 1e-05, %v1888_v34  ;;  %2844 = vrsqrt.f32 %v1893_v39 }
 0x3da   :  { %v3869_v46 = vsub.f32 %v1755_v58, %v1818_v50  ;;  %v3871_v56 = vsub.f32 %v1761_v51, %v1818_v50  ;;  %v3873_v18 = vsub.f32 %v1767_v26, %v1818_v50  ;;  %v1819_v35 = vmul.f32 0.03125, %v1815_v43 }
 0x3db   :  { %v3875_v1 = vsub.f32 %v1773_v11, %v1818_v50  ;;  %2846 = vrsqrt.f32 %v1892_v45 }
 0x3dc   :  { %v1838_v42 = vmul.f32 %v3869_v46, %v3869_v46  ;;  %v1842_v54 = vmul.f32 %v3871_v56, %v3871_v56  ;;  %v3881_v0 = vsub.f32 %v1757_v63, %v1819_v35  ;;  %v3883_v4 = vsub.f32 %v1763_v20, %v1819_v35 }
 0x3dd   :  { %v3885_v58 = vsub.f32 %v1769_v59, %v1819_v35  ;;  %v1846_v51 = vmul.f32 %v3873_v18, %v3873_v18  ;;  %v3889_v11 = vsub.f32 %v1775_v57, %v1819_v35  ;;  %v1850_v63 = vmul.f32 %v3875_v1, %v3875_v1 }
 0x3de   :  { %v1870_v26 = vadd.f32 %v1842_v54, %v1838_v42  ;;  %v1839_v14 = vmul.f32 %v3881_v0, %v3881_v0  ;;  %v1843_v61 = vmul.f32 %v3883_v4, %v3883_v4 }
 0x3df   :  { %v1847_v59 = vmul.f32 %v3885_v58, %v3885_v58  ;;  %v1851_v57 = vmul.f32 %v3889_v11, %v3889_v11 }
 0x3e0   :  { %v1871_v20 = vadd.f32 %v1870_v26, %v1846_v51  ;;  %v1879_v7 = vadd.f32 %v1843_v61, %v1839_v14 }
 0x3e2   :  { %v1872_v48 = vadd.f32 %v1871_v20, %v1850_v63  ;;  %v1880_v15 = vadd.f32 %v1879_v7, %v1847_v59  ;;  %v1778_v59 = vld [vmem:[%s3995_s13] sm:$0xf] }
 0x3e4   :  { %v1873_v21 = vrot.slane %v1872_v48, 4  ;;  %v1881_v23 = vadd.f32 %v1880_v15, %v1851_v57  ;;  %v1941_v57 = vsub.s32 2, %v3724_v24 }
 0x3e5   :  { %v2845_v10 = vpop.eup %2844 }
 0x3e6   :  { %v1874_v17 = vadd.f32 %v1873_v21, %v1872_v48  ;;  %v1882_v27 = vrot.slane %v1881_v23, 4  ;;  %v1945_v48 = vsub.s32 3, %v3724_v24  ;;  %v3913_v21 = vrot.slane %v1779_v55, %v3738_v37 }
 0x3e8   :  { %v1875_v16 = vrot.slane %v1874_v17, 2  ;;  %v1883_v29 = vadd.f32 %v1882_v27, %v1881_v23  ;;  %v2847_v51 = vpop.eup %2846  ;;  %v3915_v22 = vrot.slane %v1779_v55, %v1945_v48  ;;  %v3918_v23 = vrot.slane %v1779_v55, %v3734_v36 }
 0x3e9   :  { %v1904_v8 = vcombine.low %v2847_v51, %v2845_v10 }
 0x3ea   :  { %v1876_v30 = vadd.f32 %v1875_v16, %v1874_v17  ;;  %v1884_v32 = vrot.slane %v1883_v29, 2  ;;  %v3922_v16 = vrot.slane %v1779_v55, %v1941_v57 }
 0x3eb   :  { %v1912_v63 = vrot.slane %v1904_v8, %v3727_v9 }
 0x3ec   :  { %v1877_v33 = vrot.slane %v1876_v30, 1  ;;  %v1885_v47 = vadd.f32 %v1884_v32, %v1883_v29 }
 0x3ee   :  { %v1878_v38 = vadd.f32 %v1877_v33, %v1876_v30  ;;  %v1886_v50 = vrot.slane %v1885_v47, 1 }
 0x3f0   :  { %v1890_v43 = vmul.f32 0.03125, %v1878_v38  ;;  %v1887_v41 = vadd.f32 %v1886_v50, %v1885_v47 }
 0x3f2   :  { %v1894_v35 = vadd.f32 1e-05, %v1890_v43  ;;  %v1891_v42 = vmul.f32 0.03125, %v1887_v41  ;;  %v2034_v43 = vld [vmem:[#allocation15 + $0x70] sm:$0xff] }
 0x3f4   :  { %v1895_v54 = vadd.f32 1e-05, %v1891_v42  ;;  %2848 = vrsqrt.f32 %v1894_v35  ;;  %v2033_v35 = vld [vmem:[#allocation15 + $0x68] sm:$0xff] }
 0x3f6   :  { %2850 = vrsqrt.f32 %v1895_v54 }
 0x401   :  { %v2849_v26 = vpop.eup %2848 }
 0x403   :  { %v2851_v14 = vpop.eup %2850 }
 0x404   :  { %v1905_v61 = vcombine.low %v2849_v26, %v2851_v14  ;;  %v2032_v26 = vld [vmem:[#allocation15 + $0x60] sm:$0xff]  ;;  %v2031_v14 = vld [vmem:[#allocation15 + $0x58] sm:$0xff] }
 0x406   :  { %v1919_v20 = vrot.slane %v1905_v61, %v3727_v9 }
 0x408   :  { %v1920_v13 = vcombine.low %v1912_v63, %v1919_v20 }
 0x40a   :  { %v1927_v7 = vrot.slane %v1920_v13, %v3727_v9 }
 0x40c   :  { %v1929_v15 = vmul.f32 %v1927_v7, %v1778_v59  ;;  %v2029_v59 = vld [vmem:[#allocation15 + $0x48] sm:$0xff] }
 0x40e   :  { %v1946_v17 = vrot.slane %v1929_v15, %v1945_v48  ;;  %v1938_v9 = vrot.slane %v1929_v15, %v3738_v37  ;;  %v1934_v25 = vrot.slane %v1929_v15, %v3734_v36  ;;  %v1942_v27 = vrot.slane %v1929_v15, %v1941_v57 }
 0x410   :  { %v1952_v28 = vmul.f32 %v1938_v9, %v3833_v60  ;;  %v1954_v24 = vmul.f32 %v1946_v17, %v3881_v0  ;;  %v1951_v29 = vmul.f32 %v1934_v25, %v3839_v2  ;;  %v1953_v30 = vmul.f32 %v1942_v27, %v3869_v46 }
 0x411   :  { %v1956_v31 = vmul.f32 %v1938_v9, %v3836_v62  ;;  %v1958_v32 = vmul.f32 %v1946_v17, %v3883_v4  ;;  %v1955_v33 = vmul.f32 %v1934_v25, %v3842_v3  ;;  %v1957_v60 = vmul.f32 %v1942_v27, %v3871_v56 }
 0x412   :  { %v1989_v34 = vadd.f32 %v3913_v21, %v1952_v28  ;;  %v1991_v47 = vadd.f32 %v3915_v22, %v1954_v24  ;;  %v1988_v38 = vadd.f32 %v3918_v23, %v1951_v29  ;;  %v1990_v0 = vadd.f32 %v3922_v16, %v1953_v30  ;;  %v2026_v28 = vld [vmem:[#allocation15 + $0x30] sm:$0xff]  ;;  %v2025_v30 = vld [vmem:[#allocation15 + $0x28] sm:$0xff] }
 0x413   :  { %v1993_v2 = vadd.f32 %v3913_v21, %v1956_v31  ;;  %v1995_v46 = vadd.f32 %v3915_v22, %v1958_v32  ;;  %v1992_v3 = vadd.f32 %v3918_v23, %v1955_v33  ;;  %v1994_v45 = vadd.f32 %v3922_v16, %v1957_v60  ;;  %v2022_v32 = vld [vmem:[#allocation15 + $0x10] sm:$0xff] }
 0x414   :  { %v2005_v39 = vmax.f32 %v1989_v34, 0.0  ;;  %v2007_v62 = vmax.f32 %v1991_v47, 0.0  ;;  %v2004_v50 = vmax.f32 %v1988_v38, 0.0  ;;  %v2006_v4 = vmax.f32 %v1990_v0, 0.0  ;;  %v2021_v34 = vld [vmem:[#allocation15 + $0x8] sm:$0xff] }
 0x415   :  { %v2009_v41 = vmax.f32 %v1993_v2, 0.0  ;;  %v1960_v56 = vmul.f32 %v1938_v9, %v3852_v5  ;;  %v1962_v42 = vmul.f32 %v1946_v17, %v3885_v58  ;;  %v1959_v54 = vmul.f32 %v1934_v25, %v3855_v19  ;;  %v2030_v58 = vld [vmem:[#allocation15 + $0x50] sm:$0xff] }
 0x416   :  { %2228 = vmatprep.mubr.f32.mxu0 %v2005_v39  ;;  %2317 = vmatprep.mubr.f32.mxu1 %v2007_v62  ;;  %v1966_v10 = vmul.f32 %v1946_v17, %v3889_v11  ;;  %v2011_v51 = vmax.f32 %v1995_v46, 0.0  ;;  %v1961_v8 = vmul.f32 %v1942_v27, %v3873_v18  ;;  %v1964_v5 = vmul.f32 %v1938_v9, %v3857_v6  ;;  %v2028_v6 = vld [vmem:[#allocation15 + $0x40] sm:$0xff]  ;;  %v2027_v17 = vld [vmem:[#allocation15 + $0x38] sm:$0xff] }
 0x417   :  { %2229 = vmatmul.mubr.f32.vlgmr.msra.gmra.mxu0 %v2004_v50  ;;  %2318 = vmatmul.mubr.f32.vlgmr.msra.gmra.mxu1 %v2006_v4  ;;  %v1997_v61 = vadd.f32 %v3913_v21, %v1960_v56  ;;  %v1999_v63 = vadd.f32 %v3915_v22, %v1962_v42  ;;  %v2008_v19 = vmax.f32 %v1992_v3, 0.0  ;;  %v2010_v11 = vmax.f32 %v1994_v45, 0.0 }
 0x418   :  { %2372 = vmatpush1.msra.mxu0 %v2034_v43  ;;  %2234 = vmatprep.mubr.f32.mxu0 %v2009_v41  ;;  %v1996_v20 = vadd.f32 %v3918_v23, %v1959_v54  ;;  %v1998_v7 = vadd.f32 %v3922_v16, %v1961_v8  ;;  %v1963_v48 = vmul.f32 %v1934_v25, %v3861_v12 }
 0x419   :  { %2323 = vmatprep.mubr.f32.mxu1 %v2011_v51  ;;  %2373 = vmatprep.subr.mxu0 %v2033_v35  ;;  %v2013_v18 = vmax.f32 %v1997_v61, 0.0  ;;  %v2015_v13 = vmax.f32 %v1999_v63, 0.0  ;;  %v2001_v55 = vadd.f32 %v3913_v21, %v1964_v5  ;;  %v2003_v57 = vadd.f32 %v3915_v22, %v1966_v10  ;;  %v2576_v22 = vld [vmem:[%s3991_s9] ss:$0 sm:$0xff] }
 0x41a   :  { %2374 = vmatpush1.msra.mxu0 %v2032_v26  ;;  %v1965_v15 = vmul.f32 %v1942_v27, %v3875_v1  ;;  %v2012_v9 = vmax.f32 %v1996_v20, 0.0  ;;  %v2014_v24 = vmax.f32 %v1998_v7, 0.0  ;;  %v2000_v29 = vadd.f32 %v3918_v23, %v1963_v48  ;;  %v2024_v1 = vld [vmem:[#allocation15 + $0x20] sm:$0xff]  ;;  %v2023_v27 = vld [vmem:[#allocation15 + $0x18] sm:$0xff] }
 0x41b   :  { %2375 = vmatprep.subr.mxu0 %v2031_v14  ;;  %2235 = vmatmul.mubr.f32.gmra.mxu0 %v2008_v19  ;;  %v2017_v12 = vmax.f32 %v2001_v55, 0.0  ;;  %v2019_v25 = vmax.f32 %v2003_v57, 0.0  ;;  %v1331_v31 = vadd.f32 %v2576_v22, %v3826_v40  ;;  %v1336_v47 = vadd.f32 %v3824_v49, %v2576_v22 }
 0x41c   :  { %2324 = vmatmul.mubr.f32.gmra.mxu1 %v2010_v11  ;;  %2376 = vmatpush1.msra.mxu0 %v2030_v58  ;;  %v2002_v21 = vadd.f32 %v3922_v16, %v1965_v15  ;;  %v2016_v23 = vmax.f32 %v2000_v29, 0.0  ;;  %v2020_v16 = vld [vmem:[#allocation15] sm:$0xff]  ;;  %v1341_v60 = vadd.f32 %v2576_v22, %v3830_v52  ;;  %v1346_v0 = vadd.f32 %v3828_v44, %v2576_v22  ;;  %v2444_v44 = vld [vmem:[%s3999_s17] sm:$0x3]  ;;  %s3059_s17 = smov [#allocation18]  }
 0x41d   :  { %2240 = vmatprep.mubr.f32.mxu0 %v2013_v18  ;;  %2329 = vmatprep.mubr.f32.mxu1 %v2015_v13  ;;  %v1349_v38 = vmax.f32 %v1331_v31, 0.0  ;;  %v1350_v40 = vmax.f32 %v1336_v47, 0.0  ;;  %v2449_v54 = vrot.slane %v2444_v44, %v3734_v36  ;;  %v2453_v8 = vrot.slane %v2444_v44, %v3738_v37  ;;  %s2477_s28 = sshll.u32 %s3059_s17, 4  ;;  %s2478_s28 = int_to_ptr.vmem [resolvable:$true] %s2477_s28 }
 0x41e   :  { %2377 = vmatprep.subr.mxu0 %v2029_v59  ;;  %v2018_v33 = vmax.f32 %v2002_v21, 0.0  ;;  %v1351_v2 = vmax.f32 %v1341_v60, 0.0  ;;  %v1352_v49 = vmax.f32 %v1346_v0, 0.0  ;;  %s3012_s6 = scalar_lea.vmem %s2478_s28, 1024  ;;  %p3017_p13 = scmp.lt.s32.totalorder %s2478_s28, %s2478_s28 }
 0x41f   :  { %2378 = vmatpush1.msra.mxu0 %v2028_v6  ;;  %p3013_p12 = scmp.ne.s32.totalorder %s2478_s28, %s3012_s6  ;;  %p3018_p0 = scmp.lt.s32.totalorder %s3012_s6, %s3012_s6 }
 0x420   :  { %2379 = vmatprep.subr.mxu0 %v2027_v17  ;;  %2241 = vmatmul.mubr.f32.gmra.mxu0 %v2012_v9 }
 0x421   :  { %2330 = vmatmul.mubr.f32.gmra.mxu1 %v2014_v24  ;;  %2380 = vmatpush1.msra.mxu0 %v2026_v28  ;;  %p3019_p1 = por %p3018_p0, %p3017_p13 }
 0x422   :  { %2246 = vmatprep.mubr.f32.mxu0 %v2017_v12  ;;  %2335 = vmatprep.mubr.f32.mxu1 %v2019_v25 }
 0x423   :  { %2381 = vmatprep.subr.mxu0 %v2025_v30  ;;  %p3020_p2 = pnand %p3019_p1, %p3013_p12 }
 0x424   :  { %2382 = vmatpush1.msra.mxu0 %v2024_v1 }
 0x425   :  { %2383 = vmatprep.subr.mxu0 %v2023_v27  ;;  %2247 = vmatmul.mubr.f32.gmra.mxu0 %v2016_v23 }
 0x426   :  { %2336 = vmatmul.mubr.f32.gmra.mxu1 %v2018_v33  ;;  %2384 = vmatpush1.msra.mxu0 %v2022_v32 }
 0x427   :  { %2385 = vmatprep.subr.mxu0 %v2021_v34  ;;  %2419 = vmatprep.mubr.f32.mxu0 %v3057_v53 }
 0x428   :  { %2386 = vmatpush1.msra.mxu0 %v2020_v16 }
 0x429   :  { %2581 = vmatmul.mubr.msk.f32.vlgmr.msra.gmra.mxu0 %vm2342_vm4, %v1349_v38 }
 0x42a   :  { %2425 = vmatprep.mubr.f32.mxu0 %v3057_v53 }
 0x42d   :  { %2582 = vmatmul.mubr.msk.f32.gmra.mxu0 %vm2342_vm4, %v1350_v40 }
 0x42e   :  { %2431 = vmatprep.mubr.f32.mxu0 %v3057_v53 }
 0x431   :  { %2583 = vmatmul.mubr.msk.f32.gmra.mxu0 %vm2342_vm4, %v1351_v2 }
 0x432   :  { %2437 = vmatprep.mubr.f32.mxu0 %v3057_v53 }
 0x435   :  { %2584 = vmatmul.mubr.msk.f32.gmra.mxu0 %vm2342_vm4, %v1352_v49 }
 0x4d7   :  { %v2230_v46 = vpop.f32.mrf.mxu0  ;;  %v2319_v39 = vpop.f32.mrf.mxu1 }
 0x4d8   :  { %v2320_v42 = vadd.f32 %v2319_v39, %v2230_v46 }
 0x4d9   :  { %v2232_v62 = vpop.f32.mrf.mxu0  ;;  %v2321_v50 = vpop.f32.mrf.mxu1 }
 0x4da   :  { %v2322_v51 = vadd.f32 %v2321_v50, %v2232_v62 }
 0x4db   :  { %v2236_v4 = vpop.f32.mrf.mxu0 }
 0x4dc   :  { %v2325_v43 = vpop.f32.mrf.mxu1 }
 0x4dd   :  { %v2238_v52 = vpop.f32.mrf.mxu0  ;;  %v2326_v63 = vadd.f32 %v2325_v43, %v2236_v4 }
 0x4de   :  { %v2327_v41 = vpop.f32.mrf.mxu1 }
 0x4df   :  { %v2328_v11 = vadd.f32 %v2327_v41, %v2238_v52 }
 0x4e0   :  { %v2242_v3 = vpop.f32.mrf.mxu0 }
 0x4e1   :  { %v2331_v56 = vpop.f32.mrf.mxu1 }
 0x4e2   :  { %v2244_v45 = vpop.f32.mrf.mxu0  ;;  %v2332_v7 = vadd.f32 %v2331_v56, %v2242_v3 }
 0x4e3   :  { %v2333_v14 = vpop.f32.mrf.mxu1 }
 0x4e4   :  { %v2334_v55 = vadd.f32 %v2333_v14, %v2244_v45 }
 0x4e5   :  { %v2248_v35 = vpop.f32.mrf.mxu0 }
 0x4e6   :  { %v2337_v13 = vpop.f32.mrf.mxu1 }
 0x4e7   :  { %v2250_v53 = vpop.f32.mrf.mxu0  ;;  %v2338_v9 = vadd.f32 %v2337_v13, %v2248_v35 }
 0x4e8   :  { %v2339_v15 = vpop.f32.mrf.mxu1 }
 0x4e9   :  { %v2421_v10 = vpop.f32.mrf.mxu0  ;;  %v2340_v12 = vadd.f32 %v2339_v15, %v2250_v53 }
 0x4ea   :  { %v2422_v26 = vadd.f32 %v2421_v10, %v2320_v42 }
 0x4eb   :  { %v2423_v61 = vpop.f32.mrf.mxu0 }
 0x4ec   :  { %v2456_v5 = vadd.f32 %v2449_v54, %v2422_v26  ;;  %v2424_v19 = vadd.f32 %v2423_v61, %v2322_v51 }
 0x4ed   :  { %v2427_v58 = vpop.f32.mrf.mxu0 }
 0x4ee   :  { %2464 = vst [vmem:[#allocation18] sm:$0xff] %v2456_v5  ;;  %v2457_v20 = vadd.f32 %v2453_v8, %v2424_v19  ;;  %v2428_v18 = vadd.f32 %v2427_v58, %v2326_v63 }
 0x4ef   :  { %v2429_v59 = vpop.f32.mrf.mxu0 }
 0x4f0   :  { %2465 = vst [vmem:[#allocation18 + $0x8] sm:$0xff] %v2457_v20  ;;  %v2458_v36 = vadd.f32 %v2449_v54, %v2428_v18  ;;  %v2430_v48 = vadd.f32 %v2429_v59, %v2328_v11 }
 0x4f1   :  { %v2433_v6 = vpop.f32.mrf.mxu0 }
 0x4f2   :  { %2466 = vst [vmem:[#allocation18 + $0x10] sm:$0xff] %v2458_v36  ;;  %v2459_v37 = vadd.f32 %v2453_v8, %v2430_v48  ;;  %v2434_v57 = vadd.f32 %v2433_v6, %v2332_v7 }
 0x4f3   :  { %v2435_v17 = vpop.f32.mrf.mxu0 }
 0x4f4   :  { %2467 = vst [vmem:[#allocation18 + $0x18] sm:$0xff] %v2459_v37  ;;  %v2460_v28 = vadd.f32 %v2449_v54, %v2434_v57  ;;  %v2436_v24 = vadd.f32 %v2435_v17, %v2334_v55 }
 0x4f5   :  { %v2439_v29 = vpop.f32.mrf.mxu0 }
 0x4f6   :  { %2468 = vst [vmem:[#allocation18 + $0x20] sm:$0xff] %v2460_v28  ;;  %v2461_v25 = vadd.f32 %v2453_v8, %v2436_v24  ;;  %v2440_v30 = vadd.f32 %v2439_v29, %v2338_v9 }
 0x4f7   :  { %v2441_v21 = vpop.f32.mrf.mxu0 }
 0x4f8   :  { %2469 = vst [vmem:[#allocation18 + $0x28] sm:$0xff] %v2461_v25  ;;  %v2462_v1 = vadd.f32 %v2449_v54, %v2440_v30  ;;  %v2442_v22 = vadd.f32 %v2441_v21, %v2340_v12 }
 0x4fa   :  { %2470 = vst [vmem:[#allocation18 + $0x30] sm:$0xff] %v2462_v1  ;;  %v2463_v27 = vadd.f32 %v2453_v8, %v2442_v22 }
 0x4fc   :  { %2471 = vst [vmem:[#allocation18 + $0x38] sm:$0xff] %v2463_v27 }
 0x4fd   :  { %3023 = shalt.err (!%p3020_p2)
}
 0x4fe   :  { %2483 = dma.vmem_to_hbm [thread:$0]  %s2478_s28, 1024, %s4000_s18, [#allocation6], %s3050_s21, %s3050_s21, %s3051_s2  }
 0x4ff   :  { %3042 = dma.done.wait [#allocation6], 1024  }
 0x500   :  { %3043 = vsyncadd [#allocation6], 4294966272 }
 0x501   :  { %2491 = vsyncpa [#allocation5], 1 }
 0x502   :  { %2492 = vsyncpa [#allocation8], 1 }
 0x503   :  { %2493 = vsyncpa [#allocation11], 1 }
 0x504   :  { %2494 = vsyncpa [#allocation14], 1 }
 0x505   :  { %2495 = vsyncpa [#allocation17], 1 }
 0x506   :  { %2496 = vsyncpa [#allocation6], 1 }

</bundles_post_ra>
